<compile_context>
chip_gen: v6e
topology: v6e:2x2x1
jax: 0.10.0
libtpu: 0.0.40
codegen_flags: <defaults>
</compile_context>

<pallas_src>
import functools

import jax
import jax.numpy as jnp
from jax.experimental import pallas as pl
from jax.experimental.pallas import tpu as pltpu


# ----------------------------------------------------------------------------- kernel
def _lstm_layer_kernel(len_ref, x_ref, wih_ref, whh_ref, b_ref,
                       out_ref, hlast_ref, h_scr, c_scr, *, tc, hidden):
    """One LSTM layer: fused input projection + recurrence over a block of timesteps.

    Grid: (batch_blocks [parallel], time_blocks [arbitrary/sequential]).
    NOTE: time must stay the innermost grid axis — hlast_ref is resident across it and
    is only written on the last time block.

    len_ref  : (Bt, 1)       int32 sequence lengths (grid-invariant)
    x_ref    : (Tc, Bt, D)   layer input for this time block (f32, time-major)
    wih_ref  : (D, 4H)       input->gates weights (bf16 storage, cast to f32 in-kernel)
    whh_ref  : (H, 4H)       hidden->gates weights (bf16 storage, cast to f32 in-kernel)
    b_ref    : (1, 4H)       combined bias (f32)
    out_ref  : (Tc, Bt, H)   masked hidden outputs for this time block (f32)
    hlast_ref: (Bt, H)       hidden state at last valid timestep (resident across time)
    h_scr/c_scr: (Bt, H) f32 VMEM scratch carrying the recurrence across time blocks.
    """
    tb = pl.program_id(1)

    @pl.when(tb == 0)
    def _():
        h_scr[...] = jnp.zeros_like(h_scr)
        c_scr[...] = jnp.zeros_like(c_scr)

    bt = h_scr.shape[0]
    d_in = wih_ref.shape[0]
    lengths = len_ref[...]                                   # (Bt, 1) int32
    w_ih = wih_ref[...].astype(jnp.float32)                  # (D, 4H)
    w_hh = whh_ref[...].astype(jnp.float32)                  # (H, 4H)
    bias = b_ref[...]                                        # (1, 4H)
    t0 = tb * tc

    # Fused input projection for the whole time block: one (Tc*Bt, D) x (D, 4H) MXU
    # matmul instead of streaming a precomputed f32 gx tensor from HBM.
    x_blk = x_ref[...].astype(jnp.float32)                   # (Tc, Bt, D)
    gx = jnp.dot(x_blk.reshape(tc * bt, d_in), w_ih,
                 preferred_element_type=jnp.float32) + bias
    gx = gx.reshape(tc, bt, 4 * hidden)                      # (Tc, Bt, 4H)

    h = h_scr[...]
    c = c_scr[...]
    # Fully unrolled inner time loop (tc is a Python int) -> straight-line code with
    # static per-step indices.  Keep tc modest (<= ~16) for large H (vreg pressure).
    for i in range(tc):
        gates = gx[i] + jnp.dot(h, w_hh, preferred_element_type=jnp.float32)  # (Bt, 4H)
        # sigmoid(z) = 0.5 * (tanh(z/2) + 1): single transcendental on the (i,f,o) slab.
        sig = 0.5 * (jnp.tanh(0.5 * gates[:, :3 * hidden]) + 1.0)
        i_g = sig[:, 0 * hidden:1 * hidden]
        f_g = sig[:, 1 * hidden:2 * hidden]
        o_g = sig[:, 2 * hidden:3 * hidden]
        g_g = jnp.tanh(gates[:, 3 * hidden:])
        c_new = f_g * c + i_g * g_g
        h_new = o_g * jnp.tanh(c_new)
        # Hoisted broadcast: one (Bt, H) mask per step, reused for all three blends.
        mb = jnp.broadcast_to((t0 + i) < lengths, (bt, hidden))
        h = jnp.where(mb, h_new, h)                          # freeze state past end
        c = jnp.where(mb, c_new, c)
        out_ref[i] = jnp.where(mb, h_new, 0.0).astype(out_ref.dtype)
    h_scr[...] = h
    c_scr[...] = c

    @pl.when(tb == pl.num_programs(1) - 1)
    def _():
        hlast_ref[...] = h_scr[...].astype(hlast_ref.dtype)


def _lstm_layer(x_tm, lengths, w_ih_t, w_hh_t, bias, time_block, num_batch_blocks=1):
    """x_tm: (T_pad, B, D) f32 time-major input; lengths: (B, 1) int32.

    w_ih_t: (D, 4H) bf16, w_hh_t: (H, 4H) bf16, bias: (1, 4H) f32.
    Returns ((T_pad, B, H) masked outputs f32, (B, H) h_last f32).
    """
    T_pad, B, D = x_tm.shape
    H = w_hh_t.shape[0]
    G = 4 * H
    assert T_pad % time_block == 0 and B % num_batch_blocks == 0
    nt = T_pad // time_block
    nb = num_batch_blocks      # >1 only when Bt = B/nb keeps (8,128)-friendly blocks
    Bt = B // nb

    kernel = functools.partial(_lstm_layer_kernel, tc=time_block, hidden=H)
    out, h_last = pl.pallas_call(
        kernel,
        out_shape=(jax.ShapeDtypeStruct((T_pad, B, H), jnp.float32),
                   jax.ShapeDtypeStruct((B, H), jnp.float32)),
        grid_spec=pltpu.PrefetchScalarGridSpec(
            num_scalar_prefetch=0,
            grid=(nb, nt),
            in_specs=[
                pl.BlockSpec((Bt, 1), lambda b, t: (b, 0)),                   # lengths
                pl.BlockSpec((time_block, Bt, D), lambda b, t: (t, b, 0)),    # x block
                pl.BlockSpec((D, G), lambda b, t: (0, 0)),                    # W_ih^T
                pl.BlockSpec((H, G), lambda b, t: (0, 0)),                    # W_hh^T
                pl.BlockSpec((1, G), lambda b, t: (0, 0)),                    # bias
            ],
            out_specs=(
                pl.BlockSpec((time_block, Bt, H), lambda b, t: (t, b, 0)),    # outputs
                pl.BlockSpec((Bt, H), lambda b, t: (b, 0)),                   # h_last
            ),
            scratch_shapes=[pltpu.VMEM((Bt, H), jnp.float32),   # h carry
                            pltpu.VMEM((Bt, H), jnp.float32)],  # c carry
        ),
        compiler_params=pltpu.CompilerParams(
            # batch blocks are independent (megacore on v7x); time is the recurrence.
            dimension_semantics=("parallel", "arbitrary"),
            vmem_limit_bytes=64 * 1024 * 1024),
    )(lengths, x_tm, w_ih_t, w_hh_t, bias)
    return out, h_last


# ----------------------------------------------------------------------------- module
def init_fast_uni_lstm_params(key, ninp, nhids):
    """torch.nn.LSTM-shaped params, gate rows reordered (i,f,g,o)->(i,f,o,g), transposed."""
    params = []
    in_dim = ninp
    for h in nhids:
        key, k1, k2, k3, k4 = jax.random.split(key, 5)
        bound = 1.0 / jnp.sqrt(jnp.float32(h))
        # PyTorch row layout: (i, f, g, o)
        w_ih = jax.random.uniform(k1, (4 * h, in_dim), jnp.float32, -bound, bound)
        w_hh = jax.random.uniform(k2, (4 * h, h), jnp.float32, -bound, bound)
        b_ih = jax.random.uniform(k3, (4 * h,), jnp.float32, -bound, bound)
        b_hh = jax.random.uniform(k4, (4 * h,), jnp.float32, -bound, bound)
        # Reorder to (i, f, o, g): one contiguous sigmoid slab + one tanh slab.
        perm = jnp.concatenate([jnp.arange(0, h), jnp.arange(h, 2 * h),
                                jnp.arange(3 * h, 4 * h), jnp.arange(2 * h, 3 * h)])
        w_ih = w_ih[perm]
        w_hh = w_hh[perm]
        bias = (b_ih + b_hh)[perm]
        params.append((w_ih.T.astype(jnp.bfloat16),      # (D, 4H) bf16 storage
                       w_hh.T.astype(jnp.bfloat16),      # (H, 4H) bf16 storage
                       bias.reshape(1, 4 * h).astype(jnp.float32)))  # (1, 4H) f32
        in_dim = h
    return params


@functools.partial(jax.jit, static_argnames=("time_block", "num_batch_blocks"))
def fast_uni_lstm_forward(x, mask, params, time_block=8, num_batch_blocks=1):
    """x: (B, T, ninp), mask: (B, T) prefix 0/1 ->
       (output (B, T, H_last), last_state (B, H_last), mask)."""
    B, T, _ = x.shape
    lengths = jnp.sum(mask, axis=1).astype(jnp.int32).reshape(B, 1)
    n_tb = -(-T // time_block)
    T_pad = n_tb * time_block

    cur = jnp.transpose(x, (1, 0, 2)).astype(jnp.float32)     # (T, B, D) time-major
    if T_pad != T:
        cur = jnp.pad(cur, ((0, T_pad - T), (0, 0), (0, 0)))
    h_last = None
    for (w_ih_t, w_hh_t, bias) in params:
        cur, h_last = _lstm_layer(cur, lengths, w_ih_t, w_hh_t, bias,
                                  time_block, num_batch_blocks)
    output = jnp.transpose(cur, (1, 0, 2))[:, :T]             # (B, T, H_last)
    return output, h_last, mask


# ----------------------------------------------------------------------------- reference
def _reference_forward(x, mask, params):
    """Pure-JAX (lax.scan) reference of the same masked stacked-LSTM semantics (f32)."""
    B, T, _ = x.shape
    lengths = jnp.sum(mask, axis=1).astype(jnp.int32).reshape(B, 1)
    cur = jnp.transpose(x, (1, 0, 2)).astype(jnp.float32)     # (T, B, D)
    h_last = None
    for (w_ih_t, w_hh_t, bias) in params:
        H = w_hh_t.shape[0]
        w_ih = w_ih_t.astype(jnp.float32)
        w_hh = w_hh_t.astype(jnp.float32)
        gx = jnp.einsum('tbd,dg->tbg', cur, w_ih) + bias      # (T, B, 4H)

        def step(carry, inp):
            h_prev, c_prev = carry
            gx_t, t = inp
            gates = gx_t + jnp.dot(h_prev, w_hh)
            i_g = jax.nn.sigmoid(gates[:, 0 * H:1 * H])
            f_g = jax.nn.sigmoid(gates[:, 1 * H:2 * H])
            o_g = jax.nn.sigmoid(gates[:, 2 * H:3 * H])
            g_g = jnp.tanh(gates[:, 3 * H:4 * H])
            c_new = f_g * c_prev + i_g * g_g
            h_new = o_g * jnp.tanh(c_new)
            m = t < lengths
            h = jnp.where(m, h_new, h_prev)
            c = jnp.where(m, c_new, c_prev)
            return (h, c), jnp.where(m, h_new, 0.0)

        init = (jnp.zeros((B, H), jnp.float32), jnp.zeros((B, H), jnp.float32))
        (h_last, _), outs = jax.lax.scan(step, init, (gx, jnp.arange(T)))
        cur = outs
    return jnp.transpose(cur, (1, 0, 2)), h_last, mask


# ----------------------------------------------------------------------------- main
if __name__ == "__main__":
    key = jax.random.PRNGKey(0)
    B, T, ninp = 4, 13, 8
    nhids = [16, 32]
    time_block = 8                      # T=13 padded to 16 -> 2 sequential time blocks

    kx, kp = jax.random.split(key)
    x = jax.random.normal(kx, (B, T, ninp), jnp.float32)

    # Prefix mask with varying lengths, including one all-zero row (length 0).
    lens = jnp.array([13, 9, 0, 5], dtype=jnp.int32)
    mask = (jnp.arange(T)[None, :] < lens[:, None]).astype(jnp.float32)   # (B, T)

    params = init_fast_uni_lstm_params(kp, ninp, nhids)

    output, last_state, mask_out = fast_uni_lstm_forward(x, mask, params,
                                                         time_block=time_block)
    jax.block_until_ready((output, last_state, mask_out))

    ref_out, ref_last, _ = _reference_forward(x, mask, params)
    assert output.shape == (B, T, nhids[-1])
    assert last_state.shape == (B, nhids[-1])
    assert jnp.allclose(output, ref_out, atol=2e-3, rtol=2e-3)
    assert jnp.allclose(last_state, ref_last, atol=2e-3, rtol=2e-3)
    # zero-length row must give zero output and zero last_state
    assert jnp.all(output[2] == 0.0) and jnp.all(last_state[2] == 0.0)

    print("KERNEL_OK")
</pallas_src>

<mosaic_0001>
module attributes {stable_mosaic.version = 11 : i64} {
  func.func @_lstm_layer_kernel(%arg0: i32, %arg1: i32, %arg2: memref<4x1xi32, #tpu.memory_space<vmem>>, %arg3: memref<8x4x8xf32, #tpu.memory_space<vmem>>, %arg4: memref<8x64xbf16, #tpu.memory_space<vmem>>, %arg5: memref<16x64xbf16, #tpu.memory_space<vmem>>, %arg6: memref<1x64xf32, #tpu.memory_space<vmem>>, %arg7: memref<8x4x16xf32, #tpu.memory_space<vmem>>, %arg8: memref<4x16xf32, #tpu.memory_space<vmem>>, %arg9: memref<4x16xf32, #tpu.memory_space<vmem>>, %arg10: memref<4x16xf32, #tpu.memory_space<vmem>>) attributes {dimension_semantics = [#tpu.dimension_semantics<parallel>, #tpu.dimension_semantics<arbitrary>], iteration_bounds = array<i64: 1, 2>, scalar_prefetch = 0 : i64, scratch_operands = 2 : i64, tpu.core_type = #tpu.core_type<tc>, window_params = [{transform_indices = @transform_0, window_bounds = array<i64: 4, 1>}, {transform_indices = @transform_1, window_bounds = array<i64: 8, 4, 8>}, {pipeline_mode = #tpu.pipeline_mode<synchronous>, transform_indices = @transform_2, window_bounds = array<i64: 8, 64>}, {pipeline_mode = #tpu.pipeline_mode<synchronous>, transform_indices = @transform_3, window_bounds = array<i64: 16, 64>}, {pipeline_mode = #tpu.pipeline_mode<synchronous>, transform_indices = @transform_4, window_bounds = array<i64: 1, 64>}, {transform_indices = @transform_5, window_bounds = array<i64: 8, 4, 16>}, {transform_indices = @transform_6, window_bounds = array<i64: 4, 16>}]} {
    %c0_i32 = arith.constant 0 : i32
    %0 = arith.cmpi eq, %arg1, %c0_i32 : i32
    %1 = arith.extui %0 : i1 to i32
    %c0_i32_0 = arith.constant 0 : i32
    %2 = arith.cmpi ne, %1, %c0_i32_0 : i32
    scf.if %2 {
      %cst_79 = arith.constant 0.000000e+00 : f32
      %295 = vector.broadcast %cst_79 : f32 to vector<4x16xf32>
      %c0_80 = arith.constant 0 : index
      %c0_81 = arith.constant 0 : index
      %296 = vector.load %arg9[%c0_80, %c0_81] : memref<4x16xf32, #tpu.memory_space<vmem>>, vector<4x16xf32>
      tpu.vector_store %arg9[%c0_80, %c0_81], %295 {strides = array<i32>} : memref<4x16xf32, #tpu.memory_space<vmem>>, vector<4x16xf32>,
      %cst_82 = arith.constant 0.000000e+00 : f32
      %297 = vector.broadcast %cst_82 : f32 to vector<4x16xf32>
      %c0_83 = arith.constant 0 : index
      %c0_84 = arith.constant 0 : index
      %298 = vector.load %arg10[%c0_83, %c0_84] : memref<4x16xf32, #tpu.memory_space<vmem>>, vector<4x16xf32>
      tpu.vector_store %arg10[%c0_83, %c0_84], %297 {strides = array<i32>} : memref<4x16xf32, #tpu.memory_space<vmem>>, vector<4x16xf32>,
    } else {
    }
    %c0 = arith.constant 0 : index
    %c0_1 = arith.constant 0 : index
    %3 = vector.load %arg2[%c0, %c0_1] : memref<4x1xi32, #tpu.memory_space<vmem>>, vector<4x1xi32>
    %c0_2 = arith.constant 0 : index
    %c0_3 = arith.constant 0 : index
    %4 = vector.load %arg4[%c0_2, %c0_3] : memref<8x64xbf16, #tpu.memory_space<vmem>>, vector<8x64xbf16>
    %5 = arith.extf %4 : vector<8x64xbf16> to vector<8x64xf32>
    %c0_4 = arith.constant 0 : index
    %c0_5 = arith.constant 0 : index
    %6 = vector.load %arg5[%c0_4, %c0_5] : memref<16x64xbf16, #tpu.memory_space<vmem>>, vector<16x64xbf16>
    %7 = arith.extf %6 : vector<16x64xbf16> to vector<16x64xf32>
    %c0_6 = arith.constant 0 : index
    %c0_7 = arith.constant 0 : index
    %8 = vector.load %arg6[%c0_6, %c0_7] : memref<1x64xf32, #tpu.memory_space<vmem>>, vector<1x64xf32>
    %c8_i32 = arith.constant 8 : i32
    %9 = arith.muli %arg1, %c8_i32 : i32
    %c0_8 = arith.constant 0 : index
    %c0_9 = arith.constant 0 : index
    %c0_10 = arith.constant 0 : index
    %10 = vector.load %arg3[%c0_8, %c0_9, %c0_10] : memref<8x4x8xf32, #tpu.memory_space<vmem>>, vector<8x4x8xf32>
    %11 = vector.shape_cast %10 : vector<8x4x8xf32> to vector<32x8xf32>
    %cst = arith.constant dense<0.000000e+00> : vector<32x64xf32>
    %12 = tpu.matmul %11, %5, %cst {dimension_numbers = #tpu.dot_dimension_numbers<[1], [0], [0], [1], [0, 0, 1, 1], [], []>} : vector<32x8xf32>, vector<8x64xf32>, vector<32x64xf32> -> vector<32x64xf32>
    %13 = vector.broadcast %8 : vector<1x64xf32> to vector<32x64xf32>
    %14 = arith.addf %12, %13 : vector<32x64xf32>
    %15 = vector.shape_cast %14 : vector<32x64xf32> to vector<8x4x64xf32>
    %c0_11 = arith.constant 0 : index
    %c0_12 = arith.constant 0 : index
    %16 = vector.load %arg9[%c0_11, %c0_12] : memref<4x16xf32, #tpu.memory_space<vmem>>, vector<4x16xf32>
    %c0_13 = arith.constant 0 : index
    %c0_14 = arith.constant 0 : index
    %17 = vector.load %arg10[%c0_13, %c0_14] : memref<4x16xf32, #tpu.memory_space<vmem>>, vector<4x16xf32>
    %18 = vector.extract_strided_slice %15 {offsets = [0, 0, 0], sizes = [1, 4, 64], strides = [1, 1, 1]} : vector<8x4x64xf32> to vector<1x4x64xf32>
    %19 = vector.shape_cast %18 : vector<1x4x64xf32> to vector<4x64xf32>
    %cst_15 = arith.constant dense<0.000000e+00> : vector<4x64xf32>
    %20 = tpu.matmul %16, %7, %cst_15 {dimension_numbers = #tpu.dot_dimension_numbers<[1], [0], [0], [1], [0, 0, 1, 1], [], []>} : vector<4x16xf32>, vector<16x64xf32>, vector<4x64xf32> -> vector<4x64xf32>
    %21 = arith.addf %19, %20 : vector<4x64xf32>
    %22 = vector.extract_strided_slice %21 {offsets = [0, 0], sizes = [4, 48], strides = [1, 1]} : vector<4x64xf32> to vector<4x48xf32>
    %cst_16 = arith.constant 5.000000e-01 : f32
    %23 = vector.broadcast %cst_16 : f32 to vector<4x48xf32>
    %24 = arith.mulf %23, %22 : vector<4x48xf32>
    %25 = math.tanh %24 : vector<4x48xf32>
    %cst_17 = arith.constant 1.000000e+00 : f32
    %26 = vector.broadcast %cst_17 : f32 to vector<4x48xf32>
    %27 = arith.addf %25, %26 : vector<4x48xf32>
    %cst_18 = arith.constant 5.000000e-01 : f32
    %28 = vector.broadcast %cst_18 : f32 to vector<4x48xf32>
    %29 = arith.mulf %28, %27 : vector<4x48xf32>
    %30 = vector.extract_strided_slice %29 {offsets = [0, 0], sizes = [4, 16], strides = [1, 1]} : vector<4x48xf32> to vector<4x16xf32>
    %31 = vector.extract_strided_slice %29 {offsets = [0, 16], sizes = [4, 16], strides = [1, 1]} : vector<4x48xf32> to vector<4x16xf32>
    %32 = vector.extract_strided_slice %29 {offsets = [0, 32], sizes = [4, 16], strides = [1, 1]} : vector<4x48xf32> to vector<4x16xf32>
    %33 = vector.extract_strided_slice %21 {offsets = [0, 48], sizes = [4, 16], strides = [1, 1]} : vector<4x64xf32> to vector<4x16xf32>
    %34 = math.tanh %33 : vector<4x16xf32>
    %35 = arith.mulf %31, %17 : vector<4x16xf32>
    %36 = arith.mulf %30, %34 : vector<4x16xf32>
    %37 = arith.addf %35, %36 : vector<4x16xf32>
    %38 = math.tanh %37 : vector<4x16xf32>
    %39 = arith.mulf %32, %38 : vector<4x16xf32>
    %c0_i32_19 = arith.constant 0 : i32
    %40 = arith.addi %9, %c0_i32_19 : i32
    %41 = vector.broadcast %40 : i32 to vector<4x1xi32>
    %42 = arith.cmpi slt, %41, %3 : vector<4x1xi32>
    %43 = vector.shape_cast %42 : vector<4x1xi1> to vector<4x1xi1>
    %44 = vector.broadcast %43 : vector<4x1xi1> to vector<4x16xi1>
    %45 = arith.select %44, %39, %16 : vector<4x16xi1>, vector<4x16xf32>
    %46 = arith.select %44, %37, %17 : vector<4x16xi1>, vector<4x16xf32>
    %cst_20 = arith.constant 0.000000e+00 : f32
    %47 = vector.broadcast %cst_20 : f32 to vector<4x16xf32>
    %48 = arith.select %44, %39, %47 : vector<4x16xi1>, vector<4x16xf32>
    %c0_21 = arith.constant 0 : index
    %c0_22 = arith.constant 0 : index
    %c0_23 = arith.constant 0 : index
    %49 = vector.load %arg7[%c0_21, %c0_22, %c0_23] : memref<8x4x16xf32, #tpu.memory_space<vmem>>, vector<1x4x16xf32>
    %50 = vector.shape_cast %49 : vector<1x4x16xf32> to vector<4x16xf32>
    %51 = vector.shape_cast %48 : vector<4x16xf32> to vector<1x4x16xf32>
    tpu.vector_store %arg7[%c0_21, %c0_22, %c0_23], %51 {strides = array<i32>} : memref<8x4x16xf32, #tpu.memory_space<vmem>>, vector<1x4x16xf32>,
    %52 = vector.extract_strided_slice %15 {offsets = [1, 0, 0], sizes = [1, 4, 64], strides = [1, 1, 1]} : vector<8x4x64xf32> to vector<1x4x64xf32>
    %53 = vector.shape_cast %52 : vector<1x4x64xf32> to vector<4x64xf32>
    %cst_24 = arith.constant dense<0.000000e+00> : vector<4x64xf32>
    %54 = tpu.matmul %45, %7, %cst_24 {dimension_numbers = #tpu.dot_dimension_numbers<[1], [0], [0], [1], [0, 0, 1, 1], [], []>} : vector<4x16xf32>, vector<16x64xf32>, vector<4x64xf32> -> vector<4x64xf32>
    %55 = arith.addf %53, %54 : vector<4x64xf32>
    %56 = vector.extract_strided_slice %55 {offsets = [0, 0], sizes = [4, 48], strides = [1, 1]} : vector<4x64xf32> to vector<4x48xf32>
    %cst_25 = arith.constant 5.000000e-01 : f32
    %57 = vector.broadcast %cst_25 : f32 to vector<4x48xf32>
    %58 = arith.mulf %57, %56 : vector<4x48xf32>
    %59 = math.tanh %58 : vector<4x48xf32>
    %cst_26 = arith.constant 1.000000e+00 : f32
    %60 = vector.broadcast %cst_26 : f32 to vector<4x48xf32>
    %61 = arith.addf %59, %60 : vector<4x48xf32>
    %cst_27 = arith.constant 5.000000e-01 : f32
    %62 = vector.broadcast %cst_27 : f32 to vector<4x48xf32>
    %63 = arith.mulf %62, %61 : vector<4x48xf32>
    %64 = vector.extract_strided_slice %63 {offsets = [0, 0], sizes = [4, 16], strides = [1, 1]} : vector<4x48xf32> to vector<4x16xf32>
    %65 = vector.extract_strided_slice %63 {offsets = [0, 16], sizes = [4, 16], strides = [1, 1]} : vector<4x48xf32> to vector<4x16xf32>
    %66 = vector.extract_strided_slice %63 {offsets = [0, 32], sizes = [4, 16], strides = [1, 1]} : vector<4x48xf32> to vector<4x16xf32>
    %67 = vector.extract_strided_slice %55 {offsets = [0, 48], sizes = [4, 16], strides = [1, 1]} : vector<4x64xf32> to vector<4x16xf32>
    %68 = math.tanh %67 : vector<4x16xf32>
    %69 = arith.mulf %65, %46 : vector<4x16xf32>
    %70 = arith.mulf %64, %68 : vector<4x16xf32>
    %71 = arith.addf %69, %70 : vector<4x16xf32>
    %72 = math.tanh %71 : vector<4x16xf32>
    %73 = arith.mulf %66, %72 : vector<4x16xf32>
    %c1_i32 = arith.constant 1 : i32
    %74 = arith.addi %9, %c1_i32 : i32
    %75 = vector.broadcast %74 : i32 to vector<4x1xi32>
    %76 = arith.cmpi slt, %75, %3 : vector<4x1xi32>
    %77 = vector.shape_cast %76 : vector<4x1xi1> to vector<4x1xi1>
    %78 = vector.broadcast %77 : vector<4x1xi1> to vector<4x16xi1>
    %79 = arith.select %78, %73, %45 : vector<4x16xi1>, vector<4x16xf32>
    %80 = arith.select %78, %71, %46 : vector<4x16xi1>, vector<4x16xf32>
    %cst_28 = arith.constant 0.000000e+00 : f32
    %81 = vector.broadcast %cst_28 : f32 to vector<4x16xf32>
    %82 = arith.select %78, %73, %81 : vector<4x16xi1>, vector<4x16xf32>
    %c1 = arith.constant 1 : index
    %c0_29 = arith.constant 0 : index
    %c0_30 = arith.constant 0 : index
    %83 = vector.load %arg7[%c1, %c0_29, %c0_30] : memref<8x4x16xf32, #tpu.memory_space<vmem>>, vector<1x4x16xf32>
    %84 = vector.shape_cast %83 : vector<1x4x16xf32> to vector<4x16xf32>
    %85 = vector.shape_cast %82 : vector<4x16xf32> to vector<1x4x16xf32>
    tpu.vector_store %arg7[%c1, %c0_29, %c0_30], %85 {strides = array<i32>} : memref<8x4x16xf32, #tpu.memory_space<vmem>>, vector<1x4x16xf32>,
    %86 = vector.extract_strided_slice %15 {offsets = [2, 0, 0], sizes = [1, 4, 64], strides = [1, 1, 1]} : vector<8x4x64xf32> to vector<1x4x64xf32>
    %87 = vector.shape_cast %86 : vector<1x4x64xf32> to vector<4x64xf32>
    %cst_31 = arith.constant dense<0.000000e+00> : vector<4x64xf32>
    %88 = tpu.matmul %79, %7, %cst_31 {dimension_numbers = #tpu.dot_dimension_numbers<[1], [0], [0], [1], [0, 0, 1, 1], [], []>} : vector<4x16xf32>, vector<16x64xf32>, vector<4x64xf32> -> vector<4x64xf32>
    %89 = arith.addf %87, %88 : vector<4x64xf32>
    %90 = vector.extract_strided_slice %89 {offsets = [0, 0], sizes = [4, 48], strides = [1, 1]} : vector<4x64xf32> to vector<4x48xf32>
    %cst_32 = arith.constant 5.000000e-01 : f32
    %91 = vector.broadcast %cst_32 : f32 to vector<4x48xf32>
    %92 = arith.mulf %91, %90 : vector<4x48xf32>
    %93 = math.tanh %92 : vector<4x48xf32>
    %cst_33 = arith.constant 1.000000e+00 : f32
    %94 = vector.broadcast %cst_33 : f32 to vector<4x48xf32>
    %95 = arith.addf %93, %94 : vector<4x48xf32>
    %cst_34 = arith.constant 5.000000e-01 : f32
    %96 = vector.broadcast %cst_34 : f32 to vector<4x48xf32>
    %97 = arith.mulf %96, %95 : vector<4x48xf32>
    %98 = vector.extract_strided_slice %97 {offsets = [0, 0], sizes = [4, 16], strides = [1, 1]} : vector<4x48xf32> to vector<4x16xf32>
    %99 = vector.extract_strided_slice %97 {offsets = [0, 16], sizes = [4, 16], strides = [1, 1]} : vector<4x48xf32> to vector<4x16xf32>
    %100 = vector.extract_strided_slice %97 {offsets = [0, 32], sizes = [4, 16], strides = [1, 1]} : vector<4x48xf32> to vector<4x16xf32>
    %101 = vector.extract_strided_slice %89 {offsets = [0, 48], sizes = [4, 16], strides = [1, 1]} : vector<4x64xf32> to vector<4x16xf32>
    %102 = math.tanh %101 : vector<4x16xf32>
    %103 = arith.mulf %99, %80 : vector<4x16xf32>
    %104 = arith.mulf %98, %102 : vector<4x16xf32>
    %105 = arith.addf %103, %104 : vector<4x16xf32>
    %106 = math.tanh %105 : vector<4x16xf32>
    %107 = arith.mulf %100, %106 : vector<4x16xf32>
    %c2_i32 = arith.constant 2 : i32
    %108 = arith.addi %9, %c2_i32 : i32
    %109 = vector.broadcast %108 : i32 to vector<4x1xi32>
    %110 = arith.cmpi slt, %109, %3 : vector<4x1xi32>
    %111 = vector.shape_cast %110 : vector<4x1xi1> to vector<4x1xi1>
    %112 = vector.broadcast %111 : vector<4x1xi1> to vector<4x16xi1>
    %113 = arith.select %112, %107, %79 : vector<4x16xi1>, vector<4x16xf32>
    %114 = arith.select %112, %105, %80 : vector<4x16xi1>, vector<4x16xf32>
    %cst_35 = arith.constant 0.000000e+00 : f32
    %115 = vector.broadcast %cst_35 : f32 to vector<4x16xf32>
    %116 = arith.select %112, %107, %115 : vector<4x16xi1>, vector<4x16xf32>
    %c2 = arith.constant 2 : index
    %c0_36 = arith.constant 0 : index
    %c0_37 = arith.constant 0 : index
    %117 = vector.load %arg7[%c2, %c0_36, %c0_37] : memref<8x4x16xf32, #tpu.memory_space<vmem>>, vector<1x4x16xf32>
    %118 = vector.shape_cast %117 : vector<1x4x16xf32> to vector<4x16xf32>
    %119 = vector.shape_cast %116 : vector<4x16xf32> to vector<1x4x16xf32>
    tpu.vector_store %arg7[%c2, %c0_36, %c0_37], %119 {strides = array<i32>} : memref<8x4x16xf32, #tpu.memory_space<vmem>>, vector<1x4x16xf32>,
    %120 = vector.extract_strided_slice %15 {offsets = [3, 0, 0], sizes = [1, 4, 64], strides = [1, 1, 1]} : vector<8x4x64xf32> to vector<1x4x64xf32>
    %121 = vector.shape_cast %120 : vector<1x4x64xf32> to vector<4x64xf32>
    %cst_38 = arith.constant dense<0.000000e+00> : vector<4x64xf32>
    %122 = tpu.matmul %113, %7, %cst_38 {dimension_numbers = #tpu.dot_dimension_numbers<[1], [0], [0], [1], [0, 0, 1, 1], [], []>} : vector<4x16xf32>, vector<16x64xf32>, vector<4x64xf32> -> vector<4x64xf32>
    %123 = arith.addf %121, %122 : vector<4x64xf32>
    %124 = vector.extract_strided_slice %123 {offsets = [0, 0], sizes = [4, 48], strides = [1, 1]} : vector<4x64xf32> to vector<4x48xf32>
    %cst_39 = arith.constant 5.000000e-01 : f32
    %125 = vector.broadcast %cst_39 : f32 to vector<4x48xf32>
    %126 = arith.mulf %125, %124 : vector<4x48xf32>
    %127 = math.tanh %126 : vector<4x48xf32>
    %cst_40 = arith.constant 1.000000e+00 : f32
    %128 = vector.broadcast %cst_40 : f32 to vector<4x48xf32>
    %129 = arith.addf %127, %128 : vector<4x48xf32>
    %cst_41 = arith.constant 5.000000e-01 : f32
    %130 = vector.broadcast %cst_41 : f32 to vector<4x48xf32>
    %131 = arith.mulf %130, %129 : vector<4x48xf32>
    %132 = vector.extract_strided_slice %131 {offsets = [0, 0], sizes = [4, 16], strides = [1, 1]} : vector<4x48xf32> to vector<4x16xf32>
    %133 = vector.extract_strided_slice %131 {offsets = [0, 16], sizes = [4, 16], strides = [1, 1]} : vector<4x48xf32> to vector<4x16xf32>
    %134 = vector.extract_strided_slice %131 {offsets = [0, 32], sizes = [4, 16], strides = [1, 1]} : vector<4x48xf32> to vector<4x16xf32>
    %135 = vector.extract_strided_slice %123 {offsets = [0, 48], sizes = [4, 16], strides = [1, 1]} : vector<4x64xf32> to vector<4x16xf32>
    %136 = math.tanh %135 : vector<4x16xf32>
    %137 = arith.mulf %133, %114 : vector<4x16xf32>
    %138 = arith.mulf %132, %136 : vector<4x16xf32>
    %139 = arith.addf %137, %138 : vector<4x16xf32>
    %140 = math.tanh %139 : vector<4x16xf32>
    %141 = arith.mulf %134, %140 : vector<4x16xf32>
    %c3_i32 = arith.constant 3 : i32
    %142 = arith.addi %9, %c3_i32 : i32
    %143 = vector.broadcast %142 : i32 to vector<4x1xi32>
    %144 = arith.cmpi slt, %143, %3 : vector<4x1xi32>
    %145 = vector.shape_cast %144 : vector<4x1xi1> to vector<4x1xi1>
    %146 = vector.broadcast %145 : vector<4x1xi1> to vector<4x16xi1>
    %147 = arith.select %146, %141, %113 : vector<4x16xi1>, vector<4x16xf32>
    %148 = arith.select %146, %139, %114 : vector<4x16xi1>, vector<4x16xf32>
    %cst_42 = arith.constant 0.000000e+00 : f32
    %149 = vector.broadcast %cst_42 : f32 to vector<4x16xf32>
    %150 = arith.select %146, %141, %149 : vector<4x16xi1>, vector<4x16xf32>
    %c3 = arith.constant 3 : index
    %c0_43 = arith.constant 0 : index
    %c0_44 = arith.constant 0 : index
    %151 = vector.load %arg7[%c3, %c0_43, %c0_44] : memref<8x4x16xf32, #tpu.memory_space<vmem>>, vector<1x4x16xf32>
    %152 = vector.shape_cast %151 : vector<1x4x16xf32> to vector<4x16xf32>
    %153 = vector.shape_cast %150 : vector<4x16xf32> to vector<1x4x16xf32>
    tpu.vector_store %arg7[%c3, %c0_43, %c0_44], %153 {strides = array<i32>} : memref<8x4x16xf32, #tpu.memory_space<vmem>>, vector<1x4x16xf32>,
    %154 = vector.extract_strided_slice %15 {offsets = [4, 0, 0], sizes = [1, 4, 64], strides = [1, 1, 1]} : vector<8x4x64xf32> to vector<1x4x64xf32>
    %155 = vector.shape_cast %154 : vector<1x4x64xf32> to vector<4x64xf32>
    %cst_45 = arith.constant dense<0.000000e+00> : vector<4x64xf32>
    %156 = tpu.matmul %147, %7, %cst_45 {dimension_numbers = #tpu.dot_dimension_numbers<[1], [0], [0], [1], [0, 0, 1, 1], [], []>} : vector<4x16xf32>, vector<16x64xf32>, vector<4x64xf32> -> vector<4x64xf32>
    %157 = arith.addf %155, %156 : vector<4x64xf32>
    %158 = vector.extract_strided_slice %157 {offsets = [0, 0], sizes = [4, 48], strides = [1, 1]} : vector<4x64xf32> to vector<4x48xf32>
    %cst_46 = arith.constant 5.000000e-01 : f32
    %159 = vector.broadcast %cst_46 : f32 to vector<4x48xf32>
    %160 = arith.mulf %159, %158 : vector<4x48xf32>
    %161 = math.tanh %160 : vector<4x48xf32>
    %cst_47 = arith.constant 1.000000e+00 : f32
    %162 = vector.broadcast %cst_47 : f32 to vector<4x48xf32>
    %163 = arith.addf %161, %162 : vector<4x48xf32>
    %cst_48 = arith.constant 5.000000e-01 : f32
    %164 = vector.broadcast %cst_48 : f32 to vector<4x48xf32>
    %165 = arith.mulf %164, %163 : vector<4x48xf32>
    %166 = vector.extract_strided_slice %165 {offsets = [0, 0], sizes = [4, 16], strides = [1, 1]} : vector<4x48xf32> to vector<4x16xf32>
    %167 = vector.extract_strided_slice %165 {offsets = [0, 16], sizes = [4, 16], strides = [1, 1]} : vector<4x48xf32> to vector<4x16xf32>
    %168 = vector.extract_strided_slice %165 {offsets = [0, 32], sizes = [4, 16], strides = [1, 1]} : vector<4x48xf32> to vector<4x16xf32>
    %169 = vector.extract_strided_slice %157 {offsets = [0, 48], sizes = [4, 16], strides = [1, 1]} : vector<4x64xf32> to vector<4x16xf32>
    %170 = math.tanh %169 : vector<4x16xf32>
    %171 = arith.mulf %167, %148 : vector<4x16xf32>
    %172 = arith.mulf %166, %170 : vector<4x16xf32>
    %173 = arith.addf %171, %172 : vector<4x16xf32>
    %174 = math.tanh %173 : vector<4x16xf32>
    %175 = arith.mulf %168, %174 : vector<4x16xf32>
    %c4_i32 = arith.constant 4 : i32
    %176 = arith.addi %9, %c4_i32 : i32
    %177 = vector.broadcast %176 : i32 to vector<4x1xi32>
    %178 = arith.cmpi slt, %177, %3 : vector<4x1xi32>
    %179 = vector.shape_cast %178 : vector<4x1xi1> to vector<4x1xi1>
    %180 = vector.broadcast %179 : vector<4x1xi1> to vector<4x16xi1>
    %181 = arith.select %180, %175, %147 : vector<4x16xi1>, vector<4x16xf32>
    %182 = arith.select %180, %173, %148 : vector<4x16xi1>, vector<4x16xf32>
    %cst_49 = arith.constant 0.000000e+00 : f32
    %183 = vector.broadcast %cst_49 : f32 to vector<4x16xf32>
    %184 = arith.select %180, %175, %183 : vector<4x16xi1>, vector<4x16xf32>
    %c4 = arith.constant 4 : index
    %c0_50 = arith.constant 0 : index
    %c0_51 = arith.constant 0 : index
    %185 = vector.load %arg7[%c4, %c0_50, %c0_51] : memref<8x4x16xf32, #tpu.memory_space<vmem>>, vector<1x4x16xf32>
    %186 = vector.shape_cast %185 : vector<1x4x16xf32> to vector<4x16xf32>
    %187 = vector.shape_cast %184 : vector<4x16xf32> to vector<1x4x16xf32>
    tpu.vector_store %arg7[%c4, %c0_50, %c0_51], %187 {strides = array<i32>} : memref<8x4x16xf32, #tpu.memory_space<vmem>>, vector<1x4x16xf32>,
    %188 = vector.extract_strided_slice %15 {offsets = [5, 0, 0], sizes = [1, 4, 64], strides = [1, 1, 1]} : vector<8x4x64xf32> to vector<1x4x64xf32>
    %189 = vector.shape_cast %188 : vector<1x4x64xf32> to vector<4x64xf32>
    %cst_52 = arith.constant dense<0.000000e+00> : vector<4x64xf32>
    %190 = tpu.matmul %181, %7, %cst_52 {dimension_numbers = #tpu.dot_dimension_numbers<[1], [0], [0], [1], [0, 0, 1, 1], [], []>} : vector<4x16xf32>, vector<16x64xf32>, vector<4x64xf32> -> vector<4x64xf32>
    %191 = arith.addf %189, %190 : vector<4x64xf32>
    %192 = vector.extract_strided_slice %191 {offsets = [0, 0], sizes = [4, 48], strides = [1, 1]} : vector<4x64xf32> to vector<4x48xf32>
    %cst_53 = arith.constant 5.000000e-01 : f32
    %193 = vector.broadcast %cst_53 : f32 to vector<4x48xf32>
    %194 = arith.mulf %193, %192 : vector<4x48xf32>
    %195 = math.tanh %194 : vector<4x48xf32>
    %cst_54 = arith.constant 1.000000e+00 : f32
    %196 = vector.broadcast %cst_54 : f32 to vector<4x48xf32>
    %197 = arith.addf %195, %196 : vector<4x48xf32>
    %cst_55 = arith.constant 5.000000e-01 : f32
    %198 = vector.broadcast %cst_55 : f32 to vector<4x48xf32>
    %199 = arith.mulf %198, %197 : vector<4x48xf32>
    %200 = vector.extract_strided_slice %199 {offsets = [0, 0], sizes = [4, 16], strides = [1, 1]} : vector<4x48xf32> to vector<4x16xf32>
    %201 = vector.extract_strided_slice %199 {offsets = [0, 16], sizes = [4, 16], strides = [1, 1]} : vector<4x48xf32> to vector<4x16xf32>
    %202 = vector.extract_strided_slice %199 {offsets = [0, 32], sizes = [4, 16], strides = [1, 1]} : vector<4x48xf32> to vector<4x16xf32>
    %203 = vector.extract_strided_slice %191 {offsets = [0, 48], sizes = [4, 16], strides = [1, 1]} : vector<4x64xf32> to vector<4x16xf32>
    %204 = math.tanh %203 : vector<4x16xf32>
    %205 = arith.mulf %201, %182 : vector<4x16xf32>
    %206 = arith.mulf %200, %204 : vector<4x16xf32>
    %207 = arith.addf %205, %206 : vector<4x16xf32>
    %208 = math.tanh %207 : vector<4x16xf32>
    %209 = arith.mulf %202, %208 : vector<4x16xf32>
    %c5_i32 = arith.constant 5 : i32
    %210 = arith.addi %9, %c5_i32 : i32
    %211 = vector.broadcast %210 : i32 to vector<4x1xi32>
    %212 = arith.cmpi slt, %211, %3 : vector<4x1xi32>
    %213 = vector.shape_cast %212 : vector<4x1xi1> to vector<4x1xi1>
    %214 = vector.broadcast %213 : vector<4x1xi1> to vector<4x16xi1>
    %215 = arith.select %214, %209, %181 : vector<4x16xi1>, vector<4x16xf32>
    %216 = arith.select %214, %207, %182 : vector<4x16xi1>, vector<4x16xf32>
    %cst_56 = arith.constant 0.000000e+00 : f32
    %217 = vector.broadcast %cst_56 : f32 to vector<4x16xf32>
    %218 = arith.select %214, %209, %217 : vector<4x16xi1>, vector<4x16xf32>
    %c5 = arith.constant 5 : index
    %c0_57 = arith.constant 0 : index
    %c0_58 = arith.constant 0 : index
    %219 = vector.load %arg7[%c5, %c0_57, %c0_58] : memref<8x4x16xf32, #tpu.memory_space<vmem>>, vector<1x4x16xf32>
    %220 = vector.shape_cast %219 : vector<1x4x16xf32> to vector<4x16xf32>
    %221 = vector.shape_cast %218 : vector<4x16xf32> to vector<1x4x16xf32>
    tpu.vector_store %arg7[%c5, %c0_57, %c0_58], %221 {strides = array<i32>} : memref<8x4x16xf32, #tpu.memory_space<vmem>>, vector<1x4x16xf32>,
    %222 = vector.extract_strided_slice %15 {offsets = [6, 0, 0], sizes = [1, 4, 64], strides = [1, 1, 1]} : vector<8x4x64xf32> to vector<1x4x64xf32>
    %223 = vector.shape_cast %222 : vector<1x4x64xf32> to vector<4x64xf32>
    %cst_59 = arith.constant dense<0.000000e+00> : vector<4x64xf32>
    %224 = tpu.matmul %215, %7, %cst_59 {dimension_numbers = #tpu.dot_dimension_numbers<[1], [0], [0], [1], [0, 0, 1, 1], [], []>} : vector<4x16xf32>, vector<16x64xf32>, vector<4x64xf32> -> vector<4x64xf32>
    %225 = arith.addf %223, %224 : vector<4x64xf32>
    %226 = vector.extract_strided_slice %225 {offsets = [0, 0], sizes = [4, 48], strides = [1, 1]} : vector<4x64xf32> to vector<4x48xf32>
    %cst_60 = arith.constant 5.000000e-01 : f32
    %227 = vector.broadcast %cst_60 : f32 to vector<4x48xf32>
    %228 = arith.mulf %227, %226 : vector<4x48xf32>
    %229 = math.tanh %228 : vector<4x48xf32>
    %cst_61 = arith.constant 1.000000e+00 : f32
    %230 = vector.broadcast %cst_61 : f32 to vector<4x48xf32>
    %231 = arith.addf %229, %230 : vector<4x48xf32>
    %cst_62 = arith.constant 5.000000e-01 : f32
    %232 = vector.broadcast %cst_62 : f32 to vector<4x48xf32>
    %233 = arith.mulf %232, %231 : vector<4x48xf32>
    %234 = vector.extract_strided_slice %233 {offsets = [0, 0], sizes = [4, 16], strides = [1, 1]} : vector<4x48xf32> to vector<4x16xf32>
    %235 = vector.extract_strided_slice %233 {offsets = [0, 16], sizes = [4, 16], strides = [1, 1]} : vector<4x48xf32> to vector<4x16xf32>
    %236 = vector.extract_strided_slice %233 {offsets = [0, 32], sizes = [4, 16], strides = [1, 1]} : vector<4x48xf32> to vector<4x16xf32>
    %237 = vector.extract_strided_slice %225 {offsets = [0, 48], sizes = [4, 16], strides = [1, 1]} : vector<4x64xf32> to vector<4x16xf32>
    %238 = math.tanh %237 : vector<4x16xf32>
    %239 = arith.mulf %235, %216 : vector<4x16xf32>
    %240 = arith.mulf %234, %238 : vector<4x16xf32>
    %241 = arith.addf %239, %240 : vector<4x16xf32>
    %242 = math.tanh %241 : vector<4x16xf32>
    %243 = arith.mulf %236, %242 : vector<4x16xf32>
    %c6_i32 = arith.constant 6 : i32
    %244 = arith.addi %9, %c6_i32 : i32
    %245 = vector.broadcast %244 : i32 to vector<4x1xi32>
    %246 = arith.cmpi slt, %245, %3 : vector<4x1xi32>
    %247 = vector.shape_cast %246 : vector<4x1xi1> to vector<4x1xi1>
    %248 = vector.broadcast %247 : vector<4x1xi1> to vector<4x16xi1>
    %249 = arith.select %248, %243, %215 : vector<4x16xi1>, vector<4x16xf32>
    %250 = arith.select %248, %241, %216 : vector<4x16xi1>, vector<4x16xf32>
    %cst_63 = arith.constant 0.000000e+00 : f32
    %251 = vector.broadcast %cst_63 : f32 to vector<4x16xf32>
    %252 = arith.select %248, %243, %251 : vector<4x16xi1>, vector<4x16xf32>
    %c6 = arith.constant 6 : index
    %c0_64 = arith.constant 0 : index
    %c0_65 = arith.constant 0 : index
    %253 = vector.load %arg7[%c6, %c0_64, %c0_65] : memref<8x4x16xf32, #tpu.memory_space<vmem>>, vector<1x4x16xf32>
    %254 = vector.shape_cast %253 : vector<1x4x16xf32> to vector<4x16xf32>
    %255 = vector.shape_cast %252 : vector<4x16xf32> to vector<1x4x16xf32>
    tpu.vector_store %arg7[%c6, %c0_64, %c0_65], %255 {strides = array<i32>} : memref<8x4x16xf32, #tpu.memory_space<vmem>>, vector<1x4x16xf32>,
    %256 = vector.extract_strided_slice %15 {offsets = [7, 0, 0], sizes = [1, 4, 64], strides = [1, 1, 1]} : vector<8x4x64xf32> to vector<1x4x64xf32>
    %257 = vector.shape_cast %256 : vector<1x4x64xf32> to vector<4x64xf32>
    %cst_66 = arith.constant dense<0.000000e+00> : vector<4x64xf32>
    %258 = tpu.matmul %249, %7, %cst_66 {dimension_numbers = #tpu.dot_dimension_numbers<[1], [0], [0], [1], [0, 0, 1, 1], [], []>} : vector<4x16xf32>, vector<16x64xf32>, vector<4x64xf32> -> vector<4x64xf32>
    %259 = arith.addf %257, %258 : vector<4x64xf32>
    %260 = vector.extract_strided_slice %259 {offsets = [0, 0], sizes = [4, 48], strides = [1, 1]} : vector<4x64xf32> to vector<4x48xf32>
    %cst_67 = arith.constant 5.000000e-01 : f32
    %261 = vector.broadcast %cst_67 : f32 to vector<4x48xf32>
    %262 = arith.mulf %261, %260 : vector<4x48xf32>
    %263 = math.tanh %262 : vector<4x48xf32>
    %cst_68 = arith.constant 1.000000e+00 : f32
    %264 = vector.broadcast %cst_68 : f32 to vector<4x48xf32>
    %265 = arith.addf %263, %264 : vector<4x48xf32>
    %cst_69 = arith.constant 5.000000e-01 : f32
    %266 = vector.broadcast %cst_69 : f32 to vector<4x48xf32>
    %267 = arith.mulf %266, %265 : vector<4x48xf32>
    %268 = vector.extract_strided_slice %267 {offsets = [0, 0], sizes = [4, 16], strides = [1, 1]} : vector<4x48xf32> to vector<4x16xf32>
    %269 = vector.extract_strided_slice %267 {offsets = [0, 16], sizes = [4, 16], strides = [1, 1]} : vector<4x48xf32> to vector<4x16xf32>
    %270 = vector.extract_strided_slice %267 {offsets = [0, 32], sizes = [4, 16], strides = [1, 1]} : vector<4x48xf32> to vector<4x16xf32>
    %271 = vector.extract_strided_slice %259 {offsets = [0, 48], sizes = [4, 16], strides = [1, 1]} : vector<4x64xf32> to vector<4x16xf32>
    %272 = math.tanh %271 : vector<4x16xf32>
    %273 = arith.mulf %269, %250 : vector<4x16xf32>
    %274 = arith.mulf %268, %272 : vector<4x16xf32>
    %275 = arith.addf %273, %274 : vector<4x16xf32>
    %276 = math.tanh %275 : vector<4x16xf32>
    %277 = arith.mulf %270, %276 : vector<4x16xf32>
    %c7_i32 = arith.constant 7 : i32
    %278 = arith.addi %9, %c7_i32 : i32
    %279 = vector.broadcast %278 : i32 to vector<4x1xi32>
    %280 = arith.cmpi slt, %279, %3 : vector<4x1xi32>
    %281 = vector.shape_cast %280 : vector<4x1xi1> to vector<4x1xi1>
    %282 = vector.broadcast %281 : vector<4x1xi1> to vector<4x16xi1>
    %283 = arith.select %282, %277, %249 : vector<4x16xi1>, vector<4x16xf32>
    %284 = arith.select %282, %275, %250 : vector<4x16xi1>, vector<4x16xf32>
    %cst_70 = arith.constant 0.000000e+00 : f32
    %285 = vector.broadcast %cst_70 : f32 to vector<4x16xf32>
    %286 = arith.select %282, %277, %285 : vector<4x16xi1>, vector<4x16xf32>
    %c7 = arith.constant 7 : index
    %c0_71 = arith.constant 0 : index
    %c0_72 = arith.constant 0 : index
    %287 = vector.load %arg7[%c7, %c0_71, %c0_72] : memref<8x4x16xf32, #tpu.memory_space<vmem>>, vector<1x4x16xf32>
    %288 = vector.shape_cast %287 : vector<1x4x16xf32> to vector<4x16xf32>
    %289 = vector.shape_cast %286 : vector<4x16xf32> to vector<1x4x16xf32>
    tpu.vector_store %arg7[%c7, %c0_71, %c0_72], %289 {strides = array<i32>} : memref<8x4x16xf32, #tpu.memory_space<vmem>>, vector<1x4x16xf32>,
    %c0_73 = arith.constant 0 : index
    %c0_74 = arith.constant 0 : index
    %290 = vector.load %arg9[%c0_73, %c0_74] : memref<4x16xf32, #tpu.memory_space<vmem>>, vector<4x16xf32>
    tpu.vector_store %arg9[%c0_73, %c0_74], %283 {strides = array<i32>} : memref<4x16xf32, #tpu.memory_space<vmem>>, vector<4x16xf32>,
    %c0_75 = arith.constant 0 : index
    %c0_76 = arith.constant 0 : index
    %291 = vector.load %arg10[%c0_75, %c0_76] : memref<4x16xf32, #tpu.memory_space<vmem>>, vector<4x16xf32>
    tpu.vector_store %arg10[%c0_75, %c0_76], %284 {strides = array<i32>} : memref<4x16xf32, #tpu.memory_space<vmem>>, vector<4x16xf32>,
    %c1_i32_77 = arith.constant 1 : i32
    %292 = arith.cmpi eq, %arg1, %c1_i32_77 : i32
    %293 = arith.extui %292 : i1 to i32
    %c0_i32_78 = arith.constant 0 : i32
    %294 = arith.cmpi ne, %293, %c0_i32_78 : i32
    scf.if %294 {
      %c0_79 = arith.constant 0 : index
      %c0_80 = arith.constant 0 : index
      %295 = vector.load %arg9[%c0_79, %c0_80] : memref<4x16xf32, #tpu.memory_space<vmem>>, vector<4x16xf32>
      %c0_81 = arith.constant 0 : index
      %c0_82 = arith.constant 0 : index
      %296 = vector.load %arg8[%c0_81, %c0_82] : memref<4x16xf32, #tpu.memory_space<vmem>>, vector<4x16xf32>
      tpu.vector_store %arg8[%c0_81, %c0_82], %295 {strides = array<i32>} : memref<4x16xf32, #tpu.memory_space<vmem>>, vector<4x16xf32>,
    } else {
    }
    return
  }
  func.func @transform_0(%arg0: i32, %arg1: i32) -> (i32, i32) {
    %c0_i32 = arith.constant 0 : i32
    %c0_i32_0 = arith.constant 0 : i32
    return %arg0, %c0_i32 : i32, i32
  }
  func.func @transform_1(%arg0: i32, %arg1: i32) -> (i32, i32, i32) {
    %c0_i32 = arith.constant 0 : i32
    %c0_i32_0 = arith.constant 0 : i32
    return %arg1, %arg0, %c0_i32 : i32, i32, i32
  }
  func.func @transform_2(%arg0: i32, %arg1: i32) -> (i32, i32) {
    %c0_i32 = arith.constant 0 : i32
    %c0_i32_0 = arith.constant 0 : i32
    %c0_i32_1 = arith.constant 0 : i32
    return %c0_i32, %c0_i32_0 : i32, i32
  }
  func.func @transform_3(%arg0: i32, %arg1: i32) -> (i32, i32) {
    %c0_i32 = arith.constant 0 : i32
    %c0_i32_0 = arith.constant 0 : i32
    %c0_i32_1 = arith.constant 0 : i32
    return %c0_i32, %c0_i32_0 : i32, i32
  }
  func.func @transform_4(%arg0: i32, %arg1: i32) -> (i32, i32) {
    %c0_i32 = arith.constant 0 : i32
    %c0_i32_0 = arith.constant 0 : i32
    %c0_i32_1 = arith.constant 0 : i32
    return %c0_i32, %c0_i32_0 : i32, i32
  }
  func.func @transform_5(%arg0: i32, %arg1: i32) -> (i32, i32, i32) {
    %c0_i32 = arith.constant 0 : i32
    %c0_i32_0 = arith.constant 0 : i32
    return %arg1, %arg0, %c0_i32 : i32, i32, i32
  }
  func.func @transform_6(%arg0: i32, %arg1: i32) -> (i32, i32) {
    %c0_i32 = arith.constant 0 : i32
    %c0_i32_0 = arith.constant 0 : i32
    return %arg0, %c0_i32 : i32, i32
  }
}

module attributes {stable_mosaic.version = 11 : i64} {
  func.func @_lstm_layer_kernel(%arg0: i32, %arg1: i32, %arg2: memref<4x1xi32, #tpu.memory_space<vmem>>, %arg3: memref<8x4x16xf32, #tpu.memory_space<vmem>>, %arg4: memref<16x128xbf16, #tpu.memory_space<vmem>>, %arg5: memref<32x128xbf16, #tpu.memory_space<vmem>>, %arg6: memref<1x128xf32, #tpu.memory_space<vmem>>, %arg7: memref<8x4x32xf32, #tpu.memory_space<vmem>>, %arg8: memref<4x32xf32, #tpu.memory_space<vmem>>, %arg9: memref<4x32xf32, #tpu.memory_space<vmem>>, %arg10: memref<4x32xf32, #tpu.memory_space<vmem>>) attributes {dimension_semantics = [#tpu.dimension_semantics<parallel>, #tpu.dimension_semantics<arbitrary>], iteration_bounds = array<i64: 1, 2>, scalar_prefetch = 0 : i64, scratch_operands = 2 : i64, tpu.core_type = #tpu.core_type<tc>, window_params = [{transform_indices = @transform_0, window_bounds = array<i64: 4, 1>}, {transform_indices = @transform_1, window_bounds = array<i64: 8, 4, 16>}, {pipeline_mode = #tpu.pipeline_mode<synchronous>, transform_indices = @transform_2, window_bounds = array<i64: 16, 128>}, {pipeline_mode = #tpu.pipeline_mode<synchronous>, transform_indices = @transform_3, window_bounds = array<i64: 32, 128>}, {pipeline_mode = #tpu.pipeline_mode<synchronous>, transform_indices = @transform_4, window_bounds = array<i64: 1, 128>}, {transform_indices = @transform_5, window_bounds = array<i64: 8, 4, 32>}, {transform_indices = @transform_6, window_bounds = array<i64: 4, 32>}]} {
    %c0_i32 = arith.constant 0 : i32
    %0 = arith.cmpi eq, %arg1, %c0_i32 : i32
    %1 = arith.extui %0 : i1 to i32
    %c0_i32_0 = arith.constant 0 : i32
    %2 = arith.cmpi ne, %1, %c0_i32_0 : i32
    scf.if %2 {
      %cst_79 = arith.constant 0.000000e+00 : f32
      %295 = vector.broadcast %cst_79 : f32 to vector<4x32xf32>
      %c0_80 = arith.constant 0 : index
      %c0_81 = arith.constant 0 : index
      %296 = vector.load %arg9[%c0_80, %c0_81] : memref<4x32xf32, #tpu.memory_space<vmem>>, vector<4x32xf32>
      tpu.vector_store %arg9[%c0_80, %c0_81], %295 {strides = array<i32>} : memref<4x32xf32, #tpu.memory_space<vmem>>, vector<4x32xf32>,
      %cst_82 = arith.constant 0.000000e+00 : f32
      %297 = vector.broadcast %cst_82 : f32 to vector<4x32xf32>
      %c0_83 = arith.constant 0 : index
      %c0_84 = arith.constant 0 : index
      %298 = vector.load %arg10[%c0_83, %c0_84] : memref<4x32xf32, #tpu.memory_space<vmem>>, vector<4x32xf32>
      tpu.vector_store %arg10[%c0_83, %c0_84], %297 {strides = array<i32>} : memref<4x32xf32, #tpu.memory_space<vmem>>, vector<4x32xf32>,
    } else {
    }
    %c0 = arith.constant 0 : index
    %c0_1 = arith.constant 0 : index
    %3 = vector.load %arg2[%c0, %c0_1] : memref<4x1xi32, #tpu.memory_space<vmem>>, vector<4x1xi32>
    %c0_2 = arith.constant 0 : index
    %c0_3 = arith.constant 0 : index
    %4 = vector.load %arg4[%c0_2, %c0_3] : memref<16x128xbf16, #tpu.memory_space<vmem>>, vector<16x128xbf16>
    %5 = arith.extf %4 : vector<16x128xbf16> to vector<16x128xf32>
    %c0_4 = arith.constant 0 : index
    %c0_5 = arith.constant 0 : index
    %6 = vector.load %arg5[%c0_4, %c0_5] : memref<32x128xbf16, #tpu.memory_space<vmem>>, vector<32x128xbf16>
    %7 = arith.extf %6 : vector<32x128xbf16> to vector<32x128xf32>
    %c0_6 = arith.constant 0 : index
    %c0_7 = arith.constant 0 : index
    %8 = vector.load %arg6[%c0_6, %c0_7] : memref<1x128xf32, #tpu.memory_space<vmem>>, vector<1x128xf32>
    %c8_i32 = arith.constant 8 : i32
    %9 = arith.muli %arg1, %c8_i32 : i32
    %c0_8 = arith.constant 0 : index
    %c0_9 = arith.constant 0 : index
    %c0_10 = arith.constant 0 : index
    %10 = vector.load %arg3[%c0_8, %c0_9, %c0_10] : memref<8x4x16xf32, #tpu.memory_space<vmem>>, vector<8x4x16xf32>
    %11 = vector.shape_cast %10 : vector<8x4x16xf32> to vector<32x16xf32>
    %cst = arith.constant dense<0.000000e+00> : vector<32x128xf32>
    %12 = tpu.matmul %11, %5, %cst {dimension_numbers = #tpu.dot_dimension_numbers<[1], [0], [0], [1], [0, 0, 1, 1], [], []>} : vector<32x16xf32>, vector<16x128xf32>, vector<32x128xf32> -> vector<32x128xf32>
    %13 = vector.broadcast %8 : vector<1x128xf32> to vector<32x128xf32>
    %14 = arith.addf %12, %13 : vector<32x128xf32>
    %15 = vector.shape_cast %14 : vector<32x128xf32> to vector<8x4x128xf32>
    %c0_11 = arith.constant 0 : index
    %c0_12 = arith.constant 0 : index
    %16 = vector.load %arg9[%c0_11, %c0_12] : memref<4x32xf32, #tpu.memory_space<vmem>>, vector<4x32xf32>
    %c0_13 = arith.constant 0 : index
    %c0_14 = arith.constant 0 : index
    %17 = vector.load %arg10[%c0_13, %c0_14] : memref<4x32xf32, #tpu.memory_space<vmem>>, vector<4x32xf32>
    %18 = vector.extract_strided_slice %15 {offsets = [0, 0, 0], sizes = [1, 4, 128], strides = [1, 1, 1]} : vector<8x4x128xf32> to vector<1x4x128xf32>
    %19 = vector.shape_cast %18 : vector<1x4x128xf32> to vector<4x128xf32>
    %cst_15 = arith.constant dense<0.000000e+00> : vector<4x128xf32>
    %20 = tpu.matmul %16, %7, %cst_15 {dimension_numbers = #tpu.dot_dimension_numbers<[1], [0], [0], [1], [0, 0, 1, 1], [], []>} : vector<4x32xf32>, vector<32x128xf32>, vector<4x128xf32> -> vector<4x128xf32>
    %21 = arith.addf %19, %20 : vector<4x128xf32>
    %22 = vector.extract_strided_slice %21 {offsets = [0, 0], sizes = [4, 96], strides = [1, 1]} : vector<4x128xf32> to vector<4x96xf32>
    %cst_16 = arith.constant 5.000000e-01 : f32
    %23 = vector.broadcast %cst_16 : f32 to vector<4x96xf32>
    %24 = arith.mulf %23, %22 : vector<4x96xf32>
    %25 = math.tanh %24 : vector<4x96xf32>
    %cst_17 = arith.constant 1.000000e+00 : f32
    %26 = vector.broadcast %cst_17 : f32 to vector<4x96xf32>
    %27 = arith.addf %25, %26 : vector<4x96xf32>
    %cst_18 = arith.constant 5.000000e-01 : f32
    %28 = vector.broadcast %cst_18 : f32 to vector<4x96xf32>
    %29 = arith.mulf %28, %27 : vector<4x96xf32>
    %30 = vector.extract_strided_slice %29 {offsets = [0, 0], sizes = [4, 32], strides = [1, 1]} : vector<4x96xf32> to vector<4x32xf32>
    %31 = vector.extract_strided_slice %29 {offsets = [0, 32], sizes = [4, 32], strides = [1, 1]} : vector<4x96xf32> to vector<4x32xf32>
    %32 = vector.extract_strided_slice %29 {offsets = [0, 64], sizes = [4, 32], strides = [1, 1]} : vector<4x96xf32> to vector<4x32xf32>
    %33 = vector.extract_strided_slice %21 {offsets = [0, 96], sizes = [4, 32], strides = [1, 1]} : vector<4x128xf32> to vector<4x32xf32>
    %34 = math.tanh %33 : vector<4x32xf32>
    %35 = arith.mulf %31, %17 : vector<4x32xf32>
    %36 = arith.mulf %30, %34 : vector<4x32xf32>
    %37 = arith.addf %35, %36 : vector<4x32xf32>
    %38 = math.tanh %37 : vector<4x32xf32>
    %39 = arith.mulf %32, %38 : vector<4x32xf32>
    %c0_i32_19 = arith.constant 0 : i32
    %40 = arith.addi %9, %c0_i32_19 : i32
    %41 = vector.broadcast %40 : i32 to vector<4x1xi32>
    %42 = arith.cmpi slt, %41, %3 : vector<4x1xi32>
    %43 = vector.shape_cast %42 : vector<4x1xi1> to vector<4x1xi1>
    %44 = vector.broadcast %43 : vector<4x1xi1> to vector<4x32xi1>
    %45 = arith.select %44, %39, %16 : vector<4x32xi1>, vector<4x32xf32>
    %46 = arith.select %44, %37, %17 : vector<4x32xi1>, vector<4x32xf32>
    %cst_20 = arith.constant 0.000000e+00 : f32
    %47 = vector.broadcast %cst_20 : f32 to vector<4x32xf32>
    %48 = arith.select %44, %39, %47 : vector<4x32xi1>, vector<4x32xf32>
    %c0_21 = arith.constant 0 : index
    %c0_22 = arith.constant 0 : index
    %c0_23 = arith.constant 0 : index
    %49 = vector.load %arg7[%c0_21, %c0_22, %c0_23] : memref<8x4x32xf32, #tpu.memory_space<vmem>>, vector<1x4x32xf32>
    %50 = vector.shape_cast %49 : vector<1x4x32xf32> to vector<4x32xf32>
    %51 = vector.shape_cast %48 : vector<4x32xf32> to vector<1x4x32xf32>
    tpu.vector_store %arg7[%c0_21, %c0_22, %c0_23], %51 {strides = array<i32>} : memref<8x4x32xf32, #tpu.memory_space<vmem>>, vector<1x4x32xf32>,
    %52 = vector.extract_strided_slice %15 {offsets = [1, 0, 0], sizes = [1, 4, 128], strides = [1, 1, 1]} : vector<8x4x128xf32> to vector<1x4x128xf32>
    %53 = vector.shape_cast %52 : vector<1x4x128xf32> to vector<4x128xf32>
    %cst_24 = arith.constant dense<0.000000e+00> : vector<4x128xf32>
    %54 = tpu.matmul %45, %7, %cst_24 {dimension_numbers = #tpu.dot_dimension_numbers<[1], [0], [0], [1], [0, 0, 1, 1], [], []>} : vector<4x32xf32>, vector<32x128xf32>, vector<4x128xf32> -> vector<4x128xf32>
    %55 = arith.addf %53, %54 : vector<4x128xf32>
    %56 = vector.extract_strided_slice %55 {offsets = [0, 0], sizes = [4, 96], strides = [1, 1]} : vector<4x128xf32> to vector<4x96xf32>
    %cst_25 = arith.constant 5.000000e-01 : f32
    %57 = vector.broadcast %cst_25 : f32 to vector<4x96xf32>
    %58 = arith.mulf %57, %56 : vector<4x96xf32>
    %59 = math.tanh %58 : vector<4x96xf32>
    %cst_26 = arith.constant 1.000000e+00 : f32
    %60 = vector.broadcast %cst_26 : f32 to vector<4x96xf32>
    %61 = arith.addf %59, %60 : vector<4x96xf32>
    %cst_27 = arith.constant 5.000000e-01 : f32
    %62 = vector.broadcast %cst_27 : f32 to vector<4x96xf32>
    %63 = arith.mulf %62, %61 : vector<4x96xf32>
    %64 = vector.extract_strided_slice %63 {offsets = [0, 0], sizes = [4, 32], strides = [1, 1]} : vector<4x96xf32> to vector<4x32xf32>
    %65 = vector.extract_strided_slice %63 {offsets = [0, 32], sizes = [4, 32], strides = [1, 1]} : vector<4x96xf32> to vector<4x32xf32>
    %66 = vector.extract_strided_slice %63 {offsets = [0, 64], sizes = [4, 32], strides = [1, 1]} : vector<4x96xf32> to vector<4x32xf32>
    %67 = vector.extract_strided_slice %55 {offsets = [0, 96], sizes = [4, 32], strides = [1, 1]} : vector<4x128xf32> to vector<4x32xf32>
    %68 = math.tanh %67 : vector<4x32xf32>
    %69 = arith.mulf %65, %46 : vector<4x32xf32>
    %70 = arith.mulf %64, %68 : vector<4x32xf32>
    %71 = arith.addf %69, %70 : vector<4x32xf32>
    %72 = math.tanh %71 : vector<4x32xf32>
    %73 = arith.mulf %66, %72 : vector<4x32xf32>
    %c1_i32 = arith.constant 1 : i32
    %74 = arith.addi %9, %c1_i32 : i32
    %75 = vector.broadcast %74 : i32 to vector<4x1xi32>
    %76 = arith.cmpi slt, %75, %3 : vector<4x1xi32>
    %77 = vector.shape_cast %76 : vector<4x1xi1> to vector<4x1xi1>
    %78 = vector.broadcast %77 : vector<4x1xi1> to vector<4x32xi1>
    %79 = arith.select %78, %73, %45 : vector<4x32xi1>, vector<4x32xf32>
    %80 = arith.select %78, %71, %46 : vector<4x32xi1>, vector<4x32xf32>
    %cst_28 = arith.constant 0.000000e+00 : f32
    %81 = vector.broadcast %cst_28 : f32 to vector<4x32xf32>
    %82 = arith.select %78, %73, %81 : vector<4x32xi1>, vector<4x32xf32>
    %c1 = arith.constant 1 : index
    %c0_29 = arith.constant 0 : index
    %c0_30 = arith.constant 0 : index
    %83 = vector.load %arg7[%c1, %c0_29, %c0_30] : memref<8x4x32xf32, #tpu.memory_space<vmem>>, vector<1x4x32xf32>
    %84 = vector.shape_cast %83 : vector<1x4x32xf32> to vector<4x32xf32>
    %85 = vector.shape_cast %82 : vector<4x32xf32> to vector<1x4x32xf32>
    tpu.vector_store %arg7[%c1, %c0_29, %c0_30], %85 {strides = array<i32>} : memref<8x4x32xf32, #tpu.memory_space<vmem>>, vector<1x4x32xf32>,
    %86 = vector.extract_strided_slice %15 {offsets = [2, 0, 0], sizes = [1, 4, 128], strides = [1, 1, 1]} : vector<8x4x128xf32> to vector<1x4x128xf32>
    %87 = vector.shape_cast %86 : vector<1x4x128xf32> to vector<4x128xf32>
    %cst_31 = arith.constant dense<0.000000e+00> : vector<4x128xf32>
    %88 = tpu.matmul %79, %7, %cst_31 {dimension_numbers = #tpu.dot_dimension_numbers<[1], [0], [0], [1], [0, 0, 1, 1], [], []>} : vector<4x32xf32>, vector<32x128xf32>, vector<4x128xf32> -> vector<4x128xf32>
    %89 = arith.addf %87, %88 : vector<4x128xf32>
    %90 = vector.extract_strided_slice %89 {offsets = [0, 0], sizes = [4, 96], strides = [1, 1]} : vector<4x128xf32> to vector<4x96xf32>
    %cst_32 = arith.constant 5.000000e-01 : f32
    %91 = vector.broadcast %cst_32 : f32 to vector<4x96xf32>
    %92 = arith.mulf %91, %90 : vector<4x96xf32>
    %93 = math.tanh %92 : vector<4x96xf32>
    %cst_33 = arith.constant 1.000000e+00 : f32
    %94 = vector.broadcast %cst_33 : f32 to vector<4x96xf32>
    %95 = arith.addf %93, %94 : vector<4x96xf32>
    %cst_34 = arith.constant 5.000000e-01 : f32
    %96 = vector.broadcast %cst_34 : f32 to vector<4x96xf32>
    %97 = arith.mulf %96, %95 : vector<4x96xf32>
    %98 = vector.extract_strided_slice %97 {offsets = [0, 0], sizes = [4, 32], strides = [1, 1]} : vector<4x96xf32> to vector<4x32xf32>
    %99 = vector.extract_strided_slice %97 {offsets = [0, 32], sizes = [4, 32], strides = [1, 1]} : vector<4x96xf32> to vector<4x32xf32>
    %100 = vector.extract_strided_slice %97 {offsets = [0, 64], sizes = [4, 32], strides = [1, 1]} : vector<4x96xf32> to vector<4x32xf32>
    %101 = vector.extract_strided_slice %89 {offsets = [0, 96], sizes = [4, 32], strides = [1, 1]} : vector<4x128xf32> to vector<4x32xf32>
    %102 = math.tanh %101 : vector<4x32xf32>
    %103 = arith.mulf %99, %80 : vector<4x32xf32>
    %104 = arith.mulf %98, %102 : vector<4x32xf32>
    %105 = arith.addf %103, %104 : vector<4x32xf32>
    %106 = math.tanh %105 : vector<4x32xf32>
    %107 = arith.mulf %100, %106 : vector<4x32xf32>
    %c2_i32 = arith.constant 2 : i32
    %108 = arith.addi %9, %c2_i32 : i32
    %109 = vector.broadcast %108 : i32 to vector<4x1xi32>
    %110 = arith.cmpi slt, %109, %3 : vector<4x1xi32>
    %111 = vector.shape_cast %110 : vector<4x1xi1> to vector<4x1xi1>
    %112 = vector.broadcast %111 : vector<4x1xi1> to vector<4x32xi1>
    %113 = arith.select %112, %107, %79 : vector<4x32xi1>, vector<4x32xf32>
    %114 = arith.select %112, %105, %80 : vector<4x32xi1>, vector<4x32xf32>
    %cst_35 = arith.constant 0.000000e+00 : f32
    %115 = vector.broadcast %cst_35 : f32 to vector<4x32xf32>
    %116 = arith.select %112, %107, %115 : vector<4x32xi1>, vector<4x32xf32>
    %c2 = arith.constant 2 : index
    %c0_36 = arith.constant 0 : index
    %c0_37 = arith.constant 0 : index
    %117 = vector.load %arg7[%c2, %c0_36, %c0_37] : memref<8x4x32xf32, #tpu.memory_space<vmem>>, vector<1x4x32xf32>
    %118 = vector.shape_cast %117 : vector<1x4x32xf32> to vector<4x32xf32>
    %119 = vector.shape_cast %116 : vector<4x32xf32> to vector<1x4x32xf32>
    tpu.vector_store %arg7[%c2, %c0_36, %c0_37], %119 {strides = array<i32>} : memref<8x4x32xf32, #tpu.memory_space<vmem>>, vector<1x4x32xf32>,
    %120 = vector.extract_strided_slice %15 {offsets = [3, 0, 0], sizes = [1, 4, 128], strides = [1, 1, 1]} : vector<8x4x128xf32> to vector<1x4x128xf32>
    %121 = vector.shape_cast %120 : vector<1x4x128xf32> to vector<4x128xf32>
    %cst_38 = arith.constant dense<0.000000e+00> : vector<4x128xf32>
    %122 = tpu.matmul %113, %7, %cst_38 {dimension_numbers = #tpu.dot_dimension_numbers<[1], [0], [0], [1], [0, 0, 1, 1], [], []>} : vector<4x32xf32>, vector<32x128xf32>, vector<4x128xf32> -> vector<4x128xf32>
    %123 = arith.addf %121, %122 : vector<4x128xf32>
    %124 = vector.extract_strided_slice %123 {offsets = [0, 0], sizes = [4, 96], strides = [1, 1]} : vector<4x128xf32> to vector<4x96xf32>
    %cst_39 = arith.constant 5.000000e-01 : f32
    %125 = vector.broadcast %cst_39 : f32 to vector<4x96xf32>
    %126 = arith.mulf %125, %124 : vector<4x96xf32>
    %127 = math.tanh %126 : vector<4x96xf32>
    %cst_40 = arith.constant 1.000000e+00 : f32
    %128 = vector.broadcast %cst_40 : f32 to vector<4x96xf32>
    %129 = arith.addf %127, %128 : vector<4x96xf32>
    %cst_41 = arith.constant 5.000000e-01 : f32
    %130 = vector.broadcast %cst_41 : f32 to vector<4x96xf32>
    %131 = arith.mulf %130, %129 : vector<4x96xf32>
    %132 = vector.extract_strided_slice %131 {offsets = [0, 0], sizes = [4, 32], strides = [1, 1]} : vector<4x96xf32> to vector<4x32xf32>
    %133 = vector.extract_strided_slice %131 {offsets = [0, 32], sizes = [4, 32], strides = [1, 1]} : vector<4x96xf32> to vector<4x32xf32>
    %134 = vector.extract_strided_slice %131 {offsets = [0, 64], sizes = [4, 32], strides = [1, 1]} : vector<4x96xf32> to vector<4x32xf32>
    %135 = vector.extract_strided_slice %123 {offsets = [0, 96], sizes = [4, 32], strides = [1, 1]} : vector<4x128xf32> to vector<4x32xf32>
    %136 = math.tanh %135 : vector<4x32xf32>
    %137 = arith.mulf %133, %114 : vector<4x32xf32>
    %138 = arith.mulf %132, %136 : vector<4x32xf32>
    %139 = arith.addf %137, %138 : vector<4x32xf32>
    %140 = math.tanh %139 : vector<4x32xf32>
    %141 = arith.mulf %134, %140 : vector<4x32xf32>
    %c3_i32 = arith.constant 3 : i32
    %142 = arith.addi %9, %c3_i32 : i32
    %143 = vector.broadcast %142 : i32 to vector<4x1xi32>
    %144 = arith.cmpi slt, %143, %3 : vector<4x1xi32>
    %145 = vector.shape_cast %144 : vector<4x1xi1> to vector<4x1xi1>
    %146 = vector.broadcast %145 : vector<4x1xi1> to vector<4x32xi1>
    %147 = arith.select %146, %141, %113 : vector<4x32xi1>, vector<4x32xf32>
    %148 = arith.select %146, %139, %114 : vector<4x32xi1>, vector<4x32xf32>
    %cst_42 = arith.constant 0.000000e+00 : f32
    %149 = vector.broadcast %cst_42 : f32 to vector<4x32xf32>
    %150 = arith.select %146, %141, %149 : vector<4x32xi1>, vector<4x32xf32>
    %c3 = arith.constant 3 : index
    %c0_43 = arith.constant 0 : index
    %c0_44 = arith.constant 0 : index
    %151 = vector.load %arg7[%c3, %c0_43, %c0_44] : memref<8x4x32xf32, #tpu.memory_space<vmem>>, vector<1x4x32xf32>
    %152 = vector.shape_cast %151 : vector<1x4x32xf32> to vector<4x32xf32>
    %153 = vector.shape_cast %150 : vector<4x32xf32> to vector<1x4x32xf32>
    tpu.vector_store %arg7[%c3, %c0_43, %c0_44], %153 {strides = array<i32>} : memref<8x4x32xf32, #tpu.memory_space<vmem>>, vector<1x4x32xf32>,
    %154 = vector.extract_strided_slice %15 {offsets = [4, 0, 0], sizes = [1, 4, 128], strides = [1, 1, 1]} : vector<8x4x128xf32> to vector<1x4x128xf32>
    %155 = vector.shape_cast %154 : vector<1x4x128xf32> to vector<4x128xf32>
    %cst_45 = arith.constant dense<0.000000e+00> : vector<4x128xf32>
    %156 = tpu.matmul %147, %7, %cst_45 {dimension_numbers = #tpu.dot_dimension_numbers<[1], [0], [0], [1], [0, 0, 1, 1], [], []>} : vector<4x32xf32>, vector<32x128xf32>, vector<4x128xf32> -> vector<4x128xf32>
    %157 = arith.addf %155, %156 : vector<4x128xf32>
    %158 = vector.extract_strided_slice %157 {offsets = [0, 0], sizes = [4, 96], strides = [1, 1]} : vector<4x128xf32> to vector<4x96xf32>
    %cst_46 = arith.constant 5.000000e-01 : f32
    %159 = vector.broadcast %cst_46 : f32 to vector<4x96xf32>
    %160 = arith.mulf %159, %158 : vector<4x96xf32>
    %161 = math.tanh %160 : vector<4x96xf32>
    %cst_47 = arith.constant 1.000000e+00 : f32
    %162 = vector.broadcast %cst_47 : f32 to vector<4x96xf32>
    %163 = arith.addf %161, %162 : vector<4x96xf32>
    %cst_48 = arith.constant 5.000000e-01 : f32
    %164 = vector.broadcast %cst_48 : f32 to vector<4x96xf32>
    %165 = arith.mulf %164, %163 : vector<4x96xf32>
    %166 = vector.extract_strided_slice %165 {offsets = [0, 0], sizes = [4, 32], strides = [1, 1]} : vector<4x96xf32> to vector<4x32xf32>
    %167 = vector.extract_strided_slice %165 {offsets = [0, 32], sizes = [4, 32], strides = [1, 1]} : vector<4x96xf32> to vector<4x32xf32>
    %168 = vector.extract_strided_slice %165 {offsets = [0, 64], sizes = [4, 32], strides = [1, 1]} : vector<4x96xf32> to vector<4x32xf32>
    %169 = vector.extract_strided_slice %157 {offsets = [0, 96], sizes = [4, 32], strides = [1, 1]} : vector<4x128xf32> to vector<4x32xf32>
    %170 = math.tanh %169 : vector<4x32xf32>
    %171 = arith.mulf %167, %148 : vector<4x32xf32>
    %172 = arith.mulf %166, %170 : vector<4x32xf32>
    %173 = arith.addf %171, %172 : vector<4x32xf32>
    %174 = math.tanh %173 : vector<4x32xf32>
    %175 = arith.mulf %168, %174 : vector<4x32xf32>
    %c4_i32 = arith.constant 4 : i32
    %176 = arith.addi %9, %c4_i32 : i32
    %177 = vector.broadcast %176 : i32 to vector<4x1xi32>
    %178 = arith.cmpi slt, %177, %3 : vector<4x1xi32>
    %179 = vector.shape_cast %178 : vector<4x1xi1> to vector<4x1xi1>
    %180 = vector.broadcast %179 : vector<4x1xi1> to vector<4x32xi1>
    %181 = arith.select %180, %175, %147 : vector<4x32xi1>, vector<4x32xf32>
    %182 = arith.select %180, %173, %148 : vector<4x32xi1>, vector<4x32xf32>
    %cst_49 = arith.constant 0.000000e+00 : f32
    %183 = vector.broadcast %cst_49 : f32 to vector<4x32xf32>
    %184 = arith.select %180, %175, %183 : vector<4x32xi1>, vector<4x32xf32>
    %c4 = arith.constant 4 : index
    %c0_50 = arith.constant 0 : index
    %c0_51 = arith.constant 0 : index
    %185 = vector.load %arg7[%c4, %c0_50, %c0_51] : memref<8x4x32xf32, #tpu.memory_space<vmem>>, vector<1x4x32xf32>
    %186 = vector.shape_cast %185 : vector<1x4x32xf32> to vector<4x32xf32>
    %187 = vector.shape_cast %184 : vector<4x32xf32> to vector<1x4x32xf32>
    tpu.vector_store %arg7[%c4, %c0_50, %c0_51], %187 {strides = array<i32>} : memref<8x4x32xf32, #tpu.memory_space<vmem>>, vector<1x4x32xf32>,
    %188 = vector.extract_strided_slice %15 {offsets = [5, 0, 0], sizes = [1, 4, 128], strides = [1, 1, 1]} : vector<8x4x128xf32> to vector<1x4x128xf32>
    %189 = vector.shape_cast %188 : vector<1x4x128xf32> to vector<4x128xf32>
    %cst_52 = arith.constant dense<0.000000e+00> : vector<4x128xf32>
    %190 = tpu.matmul %181, %7, %cst_52 {dimension_numbers = #tpu.dot_dimension_numbers<[1], [0], [0], [1], [0, 0, 1, 1], [], []>} : vector<4x32xf32>, vector<32x128xf32>, vector<4x128xf32> -> vector<4x128xf32>
    %191 = arith.addf %189, %190 : vector<4x128xf32>
    %192 = vector.extract_strided_slice %191 {offsets = [0, 0], sizes = [4, 96], strides = [1, 1]} : vector<4x128xf32> to vector<4x96xf32>
    %cst_53 = arith.constant 5.000000e-01 : f32
    %193 = vector.broadcast %cst_53 : f32 to vector<4x96xf32>
    %194 = arith.mulf %193, %192 : vector<4x96xf32>
    %195 = math.tanh %194 : vector<4x96xf32>
    %cst_54 = arith.constant 1.000000e+00 : f32
    %196 = vector.broadcast %cst_54 : f32 to vector<4x96xf32>
    %197 = arith.addf %195, %196 : vector<4x96xf32>
    %cst_55 = arith.constant 5.000000e-01 : f32
    %198 = vector.broadcast %cst_55 : f32 to vector<4x96xf32>
    %199 = arith.mulf %198, %197 : vector<4x96xf32>
    %200 = vector.extract_strided_slice %199 {offsets = [0, 0], sizes = [4, 32], strides = [1, 1]} : vector<4x96xf32> to vector<4x32xf32>
    %201 = vector.extract_strided_slice %199 {offsets = [0, 32], sizes = [4, 32], strides = [1, 1]} : vector<4x96xf32> to vector<4x32xf32>
    %202 = vector.extract_strided_slice %199 {offsets = [0, 64], sizes = [4, 32], strides = [1, 1]} : vector<4x96xf32> to vector<4x32xf32>
    %203 = vector.extract_strided_slice %191 {offsets = [0, 96], sizes = [4, 32], strides = [1, 1]} : vector<4x128xf32> to vector<4x32xf32>
    %204 = math.tanh %203 : vector<4x32xf32>
    %205 = arith.mulf %201, %182 : vector<4x32xf32>
    %206 = arith.mulf %200, %204 : vector<4x32xf32>
    %207 = arith.addf %205, %206 : vector<4x32xf32>
    %208 = math.tanh %207 : vector<4x32xf32>
    %209 = arith.mulf %202, %208 : vector<4x32xf32>
    %c5_i32 = arith.constant 5 : i32
    %210 = arith.addi %9, %c5_i32 : i32
    %211 = vector.broadcast %210 : i32 to vector<4x1xi32>
    %212 = arith.cmpi slt, %211, %3 : vector<4x1xi32>
    %213 = vector.shape_cast %212 : vector<4x1xi1> to vector<4x1xi1>
    %214 = vector.broadcast %213 : vector<4x1xi1> to vector<4x32xi1>
    %215 = arith.select %214, %209, %181 : vector<4x32xi1>, vector<4x32xf32>
    %216 = arith.select %214, %207, %182 : vector<4x32xi1>, vector<4x32xf32>
    %cst_56 = arith.constant 0.000000e+00 : f32
    %217 = vector.broadcast %cst_56 : f32 to vector<4x32xf32>
    %218 = arith.select %214, %209, %217 : vector<4x32xi1>, vector<4x32xf32>
    %c5 = arith.constant 5 : index
    %c0_57 = arith.constant 0 : index
    %c0_58 = arith.constant 0 : index
    %219 = vector.load %arg7[%c5, %c0_57, %c0_58] : memref<8x4x32xf32, #tpu.memory_space<vmem>>, vector<1x4x32xf32>
    %220 = vector.shape_cast %219 : vector<1x4x32xf32> to vector<4x32xf32>
    %221 = vector.shape_cast %218 : vector<4x32xf32> to vector<1x4x32xf32>
    tpu.vector_store %arg7[%c5, %c0_57, %c0_58], %221 {strides = array<i32>} : memref<8x4x32xf32, #tpu.memory_space<vmem>>, vector<1x4x32xf32>,
    %222 = vector.extract_strided_slice %15 {offsets = [6, 0, 0], sizes = [1, 4, 128], strides = [1, 1, 1]} : vector<8x4x128xf32> to vector<1x4x128xf32>
    %223 = vector.shape_cast %222 : vector<1x4x128xf32> to vector<4x128xf32>
    %cst_59 = arith.constant dense<0.000000e+00> : vector<4x128xf32>
    %224 = tpu.matmul %215, %7, %cst_59 {dimension_numbers = #tpu.dot_dimension_numbers<[1], [0], [0], [1], [0, 0, 1, 1], [], []>} : vector<4x32xf32>, vector<32x128xf32>, vector<4x128xf32> -> vector<4x128xf32>
    %225 = arith.addf %223, %224 : vector<4x128xf32>
    %226 = vector.extract_strided_slice %225 {offsets = [0, 0], sizes = [4, 96], strides = [1, 1]} : vector<4x128xf32> to vector<4x96xf32>
    %cst_60 = arith.constant 5.000000e-01 : f32
    %227 = vector.broadcast %cst_60 : f32 to vector<4x96xf32>
    %228 = arith.mulf %227, %226 : vector<4x96xf32>
    %229 = math.tanh %228 : vector<4x96xf32>
    %cst_61 = arith.constant 1.000000e+00 : f32
    %230 = vector.broadcast %cst_61 : f32 to vector<4x96xf32>
    %231 = arith.addf %229, %230 : vector<4x96xf32>
    %cst_62 = arith.constant 5.000000e-01 : f32
    %232 = vector.broadcast %cst_62 : f32 to vector<4x96xf32>
    %233 = arith.mulf %232, %231 : vector<4x96xf32>
    %234 = vector.extract_strided_slice %233 {offsets = [0, 0], sizes = [4, 32], strides = [1, 1]} : vector<4x96xf32> to vector<4x32xf32>
    %235 = vector.extract_strided_slice %233 {offsets = [0, 32], sizes = [4, 32], strides = [1, 1]} : vector<4x96xf32> to vector<4x32xf32>
    %236 = vector.extract_strided_slice %233 {offsets = [0, 64], sizes = [4, 32], strides = [1, 1]} : vector<4x96xf32> to vector<4x32xf32>
    %237 = vector.extract_strided_slice %225 {offsets = [0, 96], sizes = [4, 32], strides = [1, 1]} : vector<4x128xf32> to vector<4x32xf32>
    %238 = math.tanh %237 : vector<4x32xf32>
    %239 = arith.mulf %235, %216 : vector<4x32xf32>
    %240 = arith.mulf %234, %238 : vector<4x32xf32>
    %241 = arith.addf %239, %240 : vector<4x32xf32>
    %242 = math.tanh %241 : vector<4x32xf32>
    %243 = arith.mulf %236, %242 : vector<4x32xf32>
    %c6_i32 = arith.constant 6 : i32
    %244 = arith.addi %9, %c6_i32 : i32
    %245 = vector.broadcast %244 : i32 to vector<4x1xi32>
    %246 = arith.cmpi slt, %245, %3 : vector<4x1xi32>
    %247 = vector.shape_cast %246 : vector<4x1xi1> to vector<4x1xi1>
    %248 = vector.broadcast %247 : vector<4x1xi1> to vector<4x32xi1>
    %249 = arith.select %248, %243, %215 : vector<4x32xi1>, vector<4x32xf32>
    %250 = arith.select %248, %241, %216 : vector<4x32xi1>, vector<4x32xf32>
    %cst_63 = arith.constant 0.000000e+00 : f32
    %251 = vector.broadcast %cst_63 : f32 to vector<4x32xf32>
    %252 = arith.select %248, %243, %251 : vector<4x32xi1>, vector<4x32xf32>
    %c6 = arith.constant 6 : index
    %c0_64 = arith.constant 0 : index
    %c0_65 = arith.constant 0 : index
    %253 = vector.load %arg7[%c6, %c0_64, %c0_65] : memref<8x4x32xf32, #tpu.memory_space<vmem>>, vector<1x4x32xf32>
    %254 = vector.shape_cast %253 : vector<1x4x32xf32> to vector<4x32xf32>
    %255 = vector.shape_cast %252 : vector<4x32xf32> to vector<1x4x32xf32>
    tpu.vector_store %arg7[%c6, %c0_64, %c0_65], %255 {strides = array<i32>} : memref<8x4x32xf32, #tpu.memory_space<vmem>>, vector<1x4x32xf32>,
    %256 = vector.extract_strided_slice %15 {offsets = [7, 0, 0], sizes = [1, 4, 128], strides = [1, 1, 1]} : vector<8x4x128xf32> to vector<1x4x128xf32>
    %257 = vector.shape_cast %256 : vector<1x4x128xf32> to vector<4x128xf32>
    %cst_66 = arith.constant dense<0.000000e+00> : vector<4x128xf32>
    %258 = tpu.matmul %249, %7, %cst_66 {dimension_numbers = #tpu.dot_dimension_numbers<[1], [0], [0], [1], [0, 0, 1, 1], [], []>} : vector<4x32xf32>, vector<32x128xf32>, vector<4x128xf32> -> vector<4x128xf32>
    %259 = arith.addf %257, %258 : vector<4x128xf32>
    %260 = vector.extract_strided_slice %259 {offsets = [0, 0], sizes = [4, 96], strides = [1, 1]} : vector<4x128xf32> to vector<4x96xf32>
    %cst_67 = arith.constant 5.000000e-01 : f32
    %261 = vector.broadcast %cst_67 : f32 to vector<4x96xf32>
    %262 = arith.mulf %261, %260 : vector<4x96xf32>
    %263 = math.tanh %262 : vector<4x96xf32>
    %cst_68 = arith.constant 1.000000e+00 : f32
    %264 = vector.broadcast %cst_68 : f32 to vector<4x96xf32>
    %265 = arith.addf %263, %264 : vector<4x96xf32>
    %cst_69 = arith.constant 5.000000e-01 : f32
    %266 = vector.broadcast %cst_69 : f32 to vector<4x96xf32>
    %267 = arith.mulf %266, %265 : vector<4x96xf32>
    %268 = vector.extract_strided_slice %267 {offsets = [0, 0], sizes = [4, 32], strides = [1, 1]} : vector<4x96xf32> to vector<4x32xf32>
    %269 = vector.extract_strided_slice %267 {offsets = [0, 32], sizes = [4, 32], strides = [1, 1]} : vector<4x96xf32> to vector<4x32xf32>
    %270 = vector.extract_strided_slice %267 {offsets = [0, 64], sizes = [4, 32], strides = [1, 1]} : vector<4x96xf32> to vector<4x32xf32>
    %271 = vector.extract_strided_slice %259 {offsets = [0, 96], sizes = [4, 32], strides = [1, 1]} : vector<4x128xf32> to vector<4x32xf32>
    %272 = math.tanh %271 : vector<4x32xf32>
    %273 = arith.mulf %269, %250 : vector<4x32xf32>
    %274 = arith.mulf %268, %272 : vector<4x32xf32>
    %275 = arith.addf %273, %274 : vector<4x32xf32>
    %276 = math.tanh %275 : vector<4x32xf32>
    %277 = arith.mulf %270, %276 : vector<4x32xf32>
    %c7_i32 = arith.constant 7 : i32
    %278 = arith.addi %9, %c7_i32 : i32
    %279 = vector.broadcast %278 : i32 to vector<4x1xi32>
    %280 = arith.cmpi slt, %279, %3 : vector<4x1xi32>
    %281 = vector.shape_cast %280 : vector<4x1xi1> to vector<4x1xi1>
    %282 = vector.broadcast %281 : vector<4x1xi1> to vector<4x32xi1>
    %283 = arith.select %282, %277, %249 : vector<4x32xi1>, vector<4x32xf32>
    %284 = arith.select %282, %275, %250 : vector<4x32xi1>, vector<4x32xf32>
    %cst_70 = arith.constant 0.000000e+00 : f32
    %285 = vector.broadcast %cst_70 : f32 to vector<4x32xf32>
    %286 = arith.select %282, %277, %285 : vector<4x32xi1>, vector<4x32xf32>
    %c7 = arith.constant 7 : index
    %c0_71 = arith.constant 0 : index
    %c0_72 = arith.constant 0 : index
    %287 = vector.load %arg7[%c7, %c0_71, %c0_72] : memref<8x4x32xf32, #tpu.memory_space<vmem>>, vector<1x4x32xf32>
    %288 = vector.shape_cast %287 : vector<1x4x32xf32> to vector<4x32xf32>
    %289 = vector.shape_cast %286 : vector<4x32xf32> to vector<1x4x32xf32>
    tpu.vector_store %arg7[%c7, %c0_71, %c0_72], %289 {strides = array<i32>} : memref<8x4x32xf32, #tpu.memory_space<vmem>>, vector<1x4x32xf32>,
    %c0_73 = arith.constant 0 : index
    %c0_74 = arith.constant 0 : index
    %290 = vector.load %arg9[%c0_73, %c0_74] : memref<4x32xf32, #tpu.memory_space<vmem>>, vector<4x32xf32>
    tpu.vector_store %arg9[%c0_73, %c0_74], %283 {strides = array<i32>} : memref<4x32xf32, #tpu.memory_space<vmem>>, vector<4x32xf32>,
    %c0_75 = arith.constant 0 : index
    %c0_76 = arith.constant 0 : index
    %291 = vector.load %arg10[%c0_75, %c0_76] : memref<4x32xf32, #tpu.memory_space<vmem>>, vector<4x32xf32>
    tpu.vector_store %arg10[%c0_75, %c0_76], %284 {strides = array<i32>} : memref<4x32xf32, #tpu.memory_space<vmem>>, vector<4x32xf32>,
    %c1_i32_77 = arith.constant 1 : i32
    %292 = arith.cmpi eq, %arg1, %c1_i32_77 : i32
    %293 = arith.extui %292 : i1 to i32
    %c0_i32_78 = arith.constant 0 : i32
    %294 = arith.cmpi ne, %293, %c0_i32_78 : i32
    scf.if %294 {
      %c0_79 = arith.constant 0 : index
      %c0_80 = arith.constant 0 : index
      %295 = vector.load %arg9[%c0_79, %c0_80] : memref<4x32xf32, #tpu.memory_space<vmem>>, vector<4x32xf32>
      %c0_81 = arith.constant 0 : index
      %c0_82 = arith.constant 0 : index
      %296 = vector.load %arg8[%c0_81, %c0_82] : memref<4x32xf32, #tpu.memory_space<vmem>>, vector<4x32xf32>
      tpu.vector_store %arg8[%c0_81, %c0_82], %295 {strides = array<i32>} : memref<4x32xf32, #tpu.memory_space<vmem>>, vector<4x32xf32>,
    } else {
    }
    return
  }
  func.func @transform_0(%arg0: i32, %arg1: i32) -> (i32, i32) {
    %c0_i32 = arith.constant 0 : i32
    %c0_i32_0 = arith.constant 0 : i32
    return %arg0, %c0_i32 : i32, i32
  }
  func.func @transform_1(%arg0: i32, %arg1: i32) -> (i32, i32, i32) {
    %c0_i32 = arith.constant 0 : i32
    %c0_i32_0 = arith.constant 0 : i32
    return %arg1, %arg0, %c0_i32 : i32, i32, i32
  }
  func.func @transform_2(%arg0: i32, %arg1: i32) -> (i32, i32) {
    %c0_i32 = arith.constant 0 : i32
    %c0_i32_0 = arith.constant 0 : i32
    %c0_i32_1 = arith.constant 0 : i32
    return %c0_i32, %c0_i32_0 : i32, i32
  }
  func.func @transform_3(%arg0: i32, %arg1: i32) -> (i32, i32) {
    %c0_i32 = arith.constant 0 : i32
    %c0_i32_0 = arith.constant 0 : i32
    %c0_i32_1 = arith.constant 0 : i32
    return %c0_i32, %c0_i32_0 : i32, i32
  }
  func.func @transform_4(%arg0: i32, %arg1: i32) -> (i32, i32) {
    %c0_i32 = arith.constant 0 : i32
    %c0_i32_0 = arith.constant 0 : i32
    %c0_i32_1 = arith.constant 0 : i32
    return %c0_i32, %c0_i32_0 : i32, i32
  }
  func.func @transform_5(%arg0: i32, %arg1: i32) -> (i32, i32, i32) {
    %c0_i32 = arith.constant 0 : i32
    %c0_i32_0 = arith.constant 0 : i32
    return %arg1, %arg0, %c0_i32 : i32, i32, i32
  }
  func.func @transform_6(%arg0: i32, %arg1: i32) -> (i32, i32) {
    %c0_i32 = arith.constant 0 : i32
    %c0_i32_0 = arith.constant 0 : i32
    return %arg0, %c0_i32 : i32, i32
  }
}

</mosaic_0001>

<bundles_post_ra>
// kernel: fast_uni_lstm_forward.2
= control target key start
LH: loop header
LB: loop body
LE: loop exit
PB: predicated region body
PF: predicated region fallthrough
CT: control target
= control target key end

     0   :  { %12 = vsyncpa [#allocation5], 0  ;;  %s1877_s21 = smov 0   ;;  %s1879_s22 = smov 0   ;;  %s2135_s0 = inlined_call_operand.vmem [shape: s32[4,1], index: 0, kind: input, shape index: {}]   ;;  %s2136_s1 = inlined_call_operand.vmem [shape: f32[16,4,8], index: 1, kind: input, shape index: {}]   ;;  %s2137_s2 = inlined_call_operand.vmem [shape: bf16[8,64], index: 2, kind: input, shape index: {}]   ;;  %s2138_s3 = inlined_call_operand.vmem [shape: bf16[16,64], index: 3, kind: input, shape index: {}]   ;;  %s2139_s4 = inlined_call_operand.vmem [shape: f32[1,64], index: 4, kind: input, shape index: {}]   ;;  %s2140_s5 = inlined_call_operand.vmem [shape: f32[16,4,16], index: 5, kind: output, shape index: {0}]   ;;  %s2141_s6 = inlined_call_operand.hbm [shape: f32[4,16], index: 6, kind: output, shape index: {1}]  }
   0x1   :  { %s1881_s23 = smov 0  }
   0x2 LB: > { %s1554_s24 = sadd.s32 4294967295, %s1831_s23   ;;  %s27_s25 = sadd.s32 1, %s1827_s22  ;;  %s1831_s23 = sphi %s1881_s23, %s18_s23   ;;  %s1827_s22 = sphi %s1879_s22, %s2144_s22   ;;  %s1823_s21 = sphi %s1877_s21, %s2143_s21  }
   0x3   : > { %p28_p0 = scmp.ge.s32.totalorder %s27_s25, 2  ;;  %p1559_p1 = scmp.ge.s32.totalorder %s1831_s23, 1 }
   0x4   : > { %p245_p2 = scmp.lt.s32.totalorder %s1831_s23, 3 }
   0x5   : > { %s2146_s25 = smov (%p28_p0, %s27_s25), 0 }
   0x6   : > { %p246_p3 = pnand %p1559_p1, %p245_p2 }
   0x7   : > { %s1899_s26 = sshll.u32 (!%p246_p3), %s1823_s21, 3  ;;  %p1564_p5 = scmp.ne.s32.totalorder (!%p246_p3), %s1823_s21, 0 }
   0x8   : > { %249 = sbr.rel (%p246_p3) target bundleno = 5574 (0x15c6), region = 40  ;;  %p290_p4 = scmp.lt.s32.totalorder (!%p246_p3), %s1899_s26, 15 }
   0xd   : > { %s291_s27 = scalar_select %p290_p4, %s1899_s26, 15 }
   0xe   : > { %310 = sbr.rel (%p1564_p5) target bundleno = 21 (0x15), region = 44 }
   0xf   : > { %s1561_s28 = sshll.u32 %s291_s27, 2 }
  0x10   : > { %s1906_s7 = scalar_lea.vmem %s2136_s1, %s1561_s28  ;;  %s1911_s10 = scalar_lea.vmem %s2140_s5, %s1561_s28 }
  0x13   : > { %vm311_vm0 = vcmask 125952   ;;  %v1833_v0 = vmov 0.0  }
  0x14   : > { %312 = vst.msk [vmem:[#allocation2] sm:$0xf] %vm311_vm0, %v1833_v0  ;;  %313 = vst.msk [vmem:[#allocation3] sm:$0xf] %vm311_vm0, %v1833_v0 }
  0x15 PF: > { %v315_v1 = vld [vmem:[%s2137_s2] sm:$0xf]  ;;  %v1834_v4 = vmov 0.0   ;;  %vm349_vm1 = vcmask 64512   ;;  %v1730_v7 = vld [vmem:[%s1906_s7 + $0x8] sm:$0xff]   ;;  %vm1835_vm2 = vmmov 0   ;;  %v558_v26 = vstv %s1899_s26 }
  0x16   : > { %v1729_v2 = vld [vmem:[%s1906_s7] sm:$0xff]   ;;  %v316_v3 = vunpack.c.l.bf16 %v315_v1  ;;  %1632 = vmatprep.subr.mxu1 %v1834_v4  ;;  %1636 = vmatprep.mubr.msk.f32.mxu1 %vm1835_vm2, %v1834_v4  ;;  %vm457_vm3 = vcmask 130048   ;;  %s1836_s17 = smov 80   ;;  %s1837_s18 = smov 16   ;;  %v1838_v27 = vmov 0   ;;  %vm576_vm6 = vcmask 125952  }
  0x17   : > { %v1592_v5 = vld [vmem:[%s2138_s3] sm:$0xff]   ;;  %1626 = vmatprep.mubr.msk.f32.mxu0 %vm349_vm1, %v1729_v2  ;;  %1727 = vset.pattern.permute.xlu0 %v1838_v27  ;;  %s1839_s27 = smov 96   ;;  %s1840_s28 = smov 112   ;;  %v1731_v60 = vld [vmem:[%s1906_s7 + $0x10] sm:$0xff]   ;;  %v1732_v61 = vld [vmem:[%s1906_s7 + $0x18] sm:$0xff]  }
  0x18   : > { %v1923_v6 = vunpack.c.h.bf16 %v1592_v5  ;;  %v1926_v8 = vunpack.c.l.bf16 %v1592_v5  ;;  %1624 = vmatprep.subr.mxu0 %v316_v3  ;;  %v1955_v11 = vld [vmem:[%s2139_s4] ss:$0 sm:$0xff]  ;;  %1728 = vset.pattern.permute.xlu1 %v1838_v27  ;;  %s678_s29 = sadd.s32 1, %s1899_s26  ;;  %s799_s30 = sadd.s32 2, %s1899_s26 }
  0x19   : > { %1625 = vmatpush3.msra.mxu0 %v316_v3  ;;  %v1964_v25 = vld [vmem:[%s2135_s0] sm:$0xf]  ;;  %v679_v50 = vstv %s678_s29  ;;  %s920_s7 = sadd.s32 3, %s1899_s26  ;;  %s1041_s8 = sadd.s32 4, %s1899_s26 }
  0x1a   : > { %1633 = vmatpush3.msra.mxu1 %v1923_v6  ;;  %1627 = vmatmul.mubr.msk.f32.vlgmr.msra.gmra.mxu0 %vm349_vm1, %v1730_v7  ;;  %vm559_vm4 = vcmp.lt.s32.totalorder %v558_v26, %v1964_v25  ;;  %vm680_vm7 = vcmp.lt.s32.totalorder %v679_v50, %v1964_v25  ;;  %s1162_s9 = sadd.s32 5, %s1899_s26  ;;  %s1283_s11 = sadd.s32 6, %s1899_s26 }
  0x1b   : > { %v1930_v9 = vld [vmem:[#allocation2] sm:$0xf]  ;;  %1634 = vmatprep.subr.mxu1 %v1834_v4  ;;  %1646 = vmatprep.subr.mxu0 %v1834_v4  ;;  %v456_v18 = vld [vmem:[#allocation3] sm:$0xf]  ;;  %v560_v28 = vsel %vm559_vm4, 1, %v1838_v27  ;;  %v681_v54 = vsel %vm680_vm7, 1, %v1838_v27 }
  0x1c   : > { %1635 = vmatpush3.msra.mxu1 %v1926_v8  ;;  %1647 = vmatpush3.msra.mxu0 %v1923_v6  ;;  %s1404_s12 = sadd.s32 7, %s1899_s26  ;;  %p1586_p6 = scmp.ne.s32.totalorder %s1823_s21, 1 }
  0x1d   : > { %1637 = vmatmul.mubr.msk.f32.vlgmr.msra.gmra.mxu1 %vm457_vm3, %v1930_v9  ;;  %1639 = vmatprep.subr.mxu1 %v1834_v4 }
  0x1e   : > { %1640 = vmatpush3.msra.mxu1 %v1923_v6  ;;  %1643 = vmatprep.mubr.msk.f32.mxu1 %vm1835_vm2, %v1834_v4 }
  0x1f   : > { %1641 = vmatprep.subr.mxu1 %v1834_v4  ;;  %1648 = vmatprep.subr.mxu0 %v1834_v4 }
  0x20   : > { %1642 = vmatpush3.msra.mxu1 %v1926_v8  ;;  %1649 = vmatpush3.msra.mxu0 %v1926_v8 }
  0x21   : > { %1653 = vmatprep.subr.mxu1 %v1834_v4  ;;  %1660 = vmatprep.subr.mxu0 %v1834_v4 }
  0x22   : > { %1629 = vmatprep.mubr.msk.f32.mxu0 %vm349_vm1, %v1731_v60 }
  0x23   : > { %1630 = vmatmul.mubr.msk.f32.gmra.mxu0 %vm349_vm1, %v1732_v61 }
  0x24   : > { %1650 = vmatprep.mubr.msk.f32.mxu0 %vm1835_vm2, %v1834_v4 }
  0xda   : > { %v1950_v10 = vpop.f32.mrf.mxu0 }
  0xdc   : > { %v424_v12 = vpop.f32.mrf.mxu0 }
  0xdd   : > { %v527_v13 = vpop.f32.mrf.mxu1  ;;  %v425_v14 = vadd.f32 %v1955_v11, %v424_v12 }
  0xdf   : > { %v1638_v15 = vpop.f32.mrf.mxu1  ;;  %v531_v16 = vadd.f32 %v527_v13, %v425_v14  ;;  %v447_v42 = vcombine.high %v425_v14, %v425_v14  ;;  %v430_v13 = vadd.f32 %v1950_v10, %v1955_v11 }
  0xe1   : > { %1733 = vtanh.f32 %v531_v16  ;;  %v532_v19 = vmul.f32 0.5, %v531_v16 }
  0xe3   : > { %1735 = vtanh.f32 %v532_v19 }
  0xee   : > { %v1734_v17 = vpop.eup %1733 }
  0xef   : > { %543 = vrot.lane.b32.xlu0 %v1734_v17, %s1836_s17 }
  0xf0   : > { %v1736_v20 = vpop.eup %1735 }
  0xf1   : > { %v534_v21 = vadd.f32 1.0, %v1736_v20 }
  0xf3   : > { %538 = vrot.lane.b32.xlu0 %v456_v18, %s1837_s18  ;;  %v535_v22 = vmul.f32 0.5, %v534_v21  ;;  %v800_v21 = vstv %s799_s30 }
  0xf4   : > { %vm801_vm9 = vcmp.lt.s32.totalorder %v800_v21, %v1964_v25 }
  0xf5   : > { %v802_v10 = vsel %vm801_vm9, 1, %v1838_v27 }
  0xf7   : > { %562 = vperm.xlu0 %1727, %v560_v28  }
 0x161   : > { %v544_v23 = vpop.permute.xlu0 %543 }
 0x162   : > { %v546_v24 = vmul.f32 %v544_v23, %v535_v22 }
 0x164   : > { %548 = vrot.lane.b32.xlu1 %v546_v24, %s1837_s18 }
 0x165   : > { %v539_v29 = vpop.permute.xlu0 %538 }
 0x166   : > { %v541_v30 = vmul.f32 %v539_v29, %v535_v22 }
 0x172   : > { %v563_v36 = vpop.permute.xlu0 %562 }
 0x173   : > { %vm564_vm5 = vcmp.eq.s32.totalorder %v563_v36, 1 }
 0x1d6   : > { %v549_v31 = vpop.permute.xlu1 %548 }
 0x1d7   : > { %v551_v32 = vadd.f32 %v549_v31, %v541_v30 }
 0x1d9   : > { %1737 = vtanh.f32 %v551_v32 }
 0x1e6   : > { %v1738_v33 = vpop.eup %1737 }
 0x1e7   : > { %554 = vrot.lane.b32.xlu1 %v1738_v33, %s1837_s18 }
 0x259   : > { %v555_v34 = vpop.permute.xlu1 %554 }
 0x25a   : > { %v557_v35 = vmul.f32 %v555_v34, %v535_v22 }
 0x25c   : > { %566 = vrot.lane.b32.xlu1 %v557_v35, %s1839_s27 }
 0x260   : > { %571 = vrot.lane.b32.xlu1 %v551_v32, %s1840_s28 }
 0x2ce   : > { %v567_v37 = vpop.permute.xlu1 %566 }
 0x2cf   : > { %v569_v38 = vsel %vm564_vm5, %v567_v37, %v1930_v9  ;;  %v575_v39 = vsel %vm564_vm5, %v567_v37, 0.0  ;;  %v2009_v9 = vpop.f32.mrf.mxu0 }
 0x2d0   : > { %577 = vst.msk [vmem:[%s1911_s10] sm:$0xf] %vm576_vm6, %v575_v39  ;;  %1644 = vmatmul.mubr.msk.f32.vlgmr.msra.gmra.mxu1 %vm457_vm3, %v569_v38 }
 0x2d1   : > { %1654 = vmatpush3.msra.mxu1 %v1923_v6  ;;  %1657 = vmatprep.mubr.msk.f32.mxu1 %vm1835_vm2, %v1834_v4  ;;  %v2011_v12 = vpop.f32.mrf.mxu0 }
 0x2d2   : > { %v572_v40 = vpop.permute.xlu1 %571  ;;  %1655 = vmatprep.subr.mxu1 %v1834_v4 }
 0x2d3   : > { %v574_v41 = vsel %vm564_vm5, %v572_v40, %v456_v18  ;;  %1656 = vmatpush3.msra.mxu1 %v1926_v8  ;;  %v448_v40 = vcombine.high %v430_v13, %v430_v13 }
 0x2d4   : > { %658 = vrot.lane.b32.xlu1 %v574_v41, %s1837_s18  ;;  %1667 = vmatprep.subr.mxu1 %v1834_v4 }
 0x346   : > { %v659_v55 = vpop.permute.xlu1 %658 }
 0x390   : > { %v647_v43 = vpop.f32.mrf.mxu1 }
 0x391   : > { %v651_v44 = vadd.f32 %v647_v43, %v447_v42 }
 0x392   : > { %v1645_v45 = vpop.f32.mrf.mxu1 }
 0x393   : > { %1739 = vtanh.f32 %v651_v44  ;;  %v652_v47 = vmul.f32 0.5, %v651_v44 }
 0x395   : > { %1741 = vtanh.f32 %v652_v47 }
 0x3a0   : > { %v1740_v46 = vpop.eup %1739 }
 0x3a1   : > { %663 = vrot.lane.b32.xlu0 %v1740_v46, %s1836_s17 }
 0x3a2   : > { %v1742_v48 = vpop.eup %1741 }
 0x3a3   : > { %v654_v49 = vadd.f32 1.0, %v1742_v48  ;;  %v921_v48 = vstv %s920_s7 }
 0x3a4   : > { %vm922_vm11 = vcmp.lt.s32.totalorder %v921_v48, %v1964_v25 }
 0x3a5   : > { %v655_v51 = vmul.f32 0.5, %v654_v49 }
 0x3a7   : > { %v661_v56 = vmul.f32 %v659_v55, %v655_v51 }
 0x413   : > { %v664_v52 = vpop.permute.xlu0 %663 }
 0x414   : > { %v666_v53 = vmul.f32 %v664_v52, %v655_v51  ;;  %v923_v52 = vsel %vm922_vm11, 1, %v1838_v27 }
 0x416   : > { %668 = vrot.lane.b32.xlu0 %v666_v53, %s1837_s18 }
 0x41a   : > { %683 = vperm.xlu0 %1727, %v681_v54  }
 0x488   : > { %v669_v57 = vpop.permute.xlu0 %668 }
 0x489   : > { %v671_v58 = vadd.f32 %v669_v57, %v661_v56 }
 0x48b   : > { %1743 = vtanh.f32 %v671_v58  ;;  %692 = vrot.lane.b32.xlu0 %v671_v58, %s1840_s28 }
 0x495   : > { %v684_v62 = vpop.permute.xlu0 %683 }
 0x496   : > { %vm685_vm8 = vcmp.eq.s32.totalorder %v684_v62, 1 }
 0x498   : > { %v1744_v59 = vpop.eup %1743 }
 0x499   : > { %674 = vrot.lane.b32.xlu1 %v1744_v59, %s1837_s18 }
 0x4fd   : > { %v693_v63 = vpop.permute.xlu0 %692 }
 0x4fe   : > { %v695_v0 = vsel %vm685_vm8, %v693_v63, %v574_v41 }
 0x4ff   : > { %779 = vrot.lane.b32.xlu0 %v695_v0, %s1837_s18 }
 0x50b   : > { %v675_v1 = vpop.permute.xlu1 %674 }
 0x50c   : > { %v677_v2 = vmul.f32 %v675_v1, %v655_v51 }
 0x50e   : > { %687 = vrot.lane.b32.xlu1 %v677_v2, %s1839_s27  ;;  %v435_v2 = vadd.f32 %v1955_v11, %v2011_v12 }
 0x571   : > { %v780_v26 = vpop.permute.xlu0 %779 }
 0x580   : > { %v688_v3 = vpop.permute.xlu1 %687 }
 0x581   : > { %v690_v5 = vsel %vm685_vm8, %v688_v3, %v569_v38  ;;  %v696_v7 = vsel %vm685_vm8, %v688_v3, 0.0 }
 0x582   : > { %1573 = vst.msk [vmem:[%s1911_s10 + $0x4] sm:$0xf] %vm576_vm6, %v696_v7  ;;  %1651 = vmatmul.mubr.msk.f32.vlgmr.msra.gmra.mxu0 %vm457_vm3, %v690_v5 }
 0x583   : > { %1661 = vmatpush3.msra.mxu0 %v1923_v6  ;;  %1664 = vmatprep.mubr.msk.f32.mxu0 %vm1835_vm2, %v1834_v4 }
 0x584   : > { %1662 = vmatprep.subr.mxu0 %v1834_v4 }
 0x585   : > { %1663 = vmatpush3.msra.mxu0 %v1926_v8 }
 0x586   : > { %1674 = vmatprep.subr.mxu0 %v1834_v4 }
 0x642   : > { %v768_v14 = vpop.f32.mrf.mxu0 }
 0x643   : > { %v772_v15 = vadd.f32 %v768_v14, %v430_v13 }
 0x644   : > { %v1652_v16 = vpop.f32.mrf.mxu0 }
 0x645   : > { %1745 = vtanh.f32 %v772_v15  ;;  %v773_v18 = vmul.f32 0.5, %v772_v15 }
 0x647   : > { %1747 = vtanh.f32 %v773_v18 }
 0x652   : > { %v1746_v17 = vpop.eup %1745 }
 0x653   : > { %784 = vrot.lane.b32.xlu1 %v1746_v17, %s1836_s17  ;;  %v1042_v17 = vstv %s1041_s8 }
 0x654   : > { %v1748_v19 = vpop.eup %1747  ;;  %vm1043_vm13 = vcmp.lt.s32.totalorder %v1042_v17, %v1964_v25 }
 0x655   : > { %v775_v20 = vadd.f32 1.0, %v1748_v19  ;;  %v1044_v12 = vsel %vm1043_vm13, 1, %v1838_v27 }
 0x657   : > { %v776_v22 = vmul.f32 0.5, %v775_v20 }
 0x659   : > { %v782_v28 = vmul.f32 %v780_v26, %v776_v22 }
 0x6c5   : > { %v785_v23 = vpop.permute.xlu1 %784 }
 0x6c6   : > { %v787_v24 = vmul.f32 %v785_v23, %v776_v22 }
 0x6c8   : > { %789 = vrot.lane.b32.xlu1 %v787_v24, %s1837_s18 }
 0x6cc   : > { %804 = vperm.xlu1 %1728, %v802_v10  }
 0x73a   : > { %v790_v29 = vpop.permute.xlu1 %789 }
 0x73b   : > { %v792_v30 = vadd.f32 %v790_v29, %v782_v28 }
 0x73d   : > { %1749 = vtanh.f32 %v792_v30  ;;  %813 = vrot.lane.b32.xlu1 %v792_v30, %s1840_s28 }
 0x747   : > { %v805_v32 = vpop.permute.xlu1 %804 }
 0x748   : > { %vm806_vm10 = vcmp.eq.s32.totalorder %v805_v32, 1 }
 0x74a   : > { %v1750_v31 = vpop.eup %1749 }
 0x74b   : > { %795 = vrot.lane.b32.xlu0 %v1750_v31, %s1837_s18 }
 0x7af   : > { %v814_v33 = vpop.permute.xlu1 %813 }
 0x7b0   : > { %v816_v34 = vsel %vm806_vm10, %v814_v33, %v695_v0 }
 0x7b1   : > { %900 = vrot.lane.b32.xlu1 %v816_v34, %s1837_s18 }
 0x7bd   : > { %v796_v35 = vpop.permute.xlu0 %795 }
 0x7be   : > { %v798_v36 = vmul.f32 %v796_v35, %v776_v22  ;;  %v449_v35 = vcombine.high %v435_v2, %v435_v2 }
 0x7c0   : > { %808 = vrot.lane.b32.xlu0 %v798_v36, %s1839_s27 }
 0x823   : > { %v901_v53 = vpop.permute.xlu1 %900 }
 0x832   : > { %v809_v37 = vpop.permute.xlu0 %808 }
 0x833   : > { %v811_v38 = vsel %vm806_vm10, %v809_v37, %v690_v5  ;;  %v817_v39 = vsel %vm806_vm10, %v809_v37, 0.0 }
 0x834   : > { %1575 = vst.msk [vmem:[%s1911_s10 + $0x8] sm:$0xf] %vm576_vm6, %v817_v39  ;;  %1658 = vmatmul.mubr.msk.f32.vlgmr.msra.gmra.mxu1 %vm457_vm3, %v811_v38 }
 0x835   : > { %1668 = vmatpush3.msra.mxu1 %v1923_v6  ;;  %1671 = vmatprep.mubr.msk.f32.mxu1 %vm1835_vm2, %v1834_v4 }
 0x836   : > { %1669 = vmatprep.subr.mxu1 %v1834_v4 }
 0x837   : > { %1670 = vmatpush3.msra.mxu1 %v1926_v8 }
 0x838   : > { %1681 = vmatprep.subr.mxu1 %v1834_v4 }
 0x8f4   : > { %v889_v41 = vpop.f32.mrf.mxu1 }
 0x8f5   : > { %v893_v42 = vadd.f32 %v889_v41, %v448_v40 }
 0x8f6   : > { %v1659_v43 = vpop.f32.mrf.mxu1 }
 0x8f7   : > { %1751 = vtanh.f32 %v893_v42  ;;  %v894_v45 = vmul.f32 0.5, %v893_v42 }
 0x8f9   : > { %1753 = vtanh.f32 %v894_v45 }
 0x904   : > { %v1752_v44 = vpop.eup %1751 }
 0x905   : > { %905 = vrot.lane.b32.xlu0 %v1752_v44, %s1836_s17 }
 0x906   : > { %v1754_v46 = vpop.eup %1753 }
 0x907   : > { %v896_v47 = vadd.f32 1.0, %v1754_v46 }
 0x909   : > { %v897_v49 = vmul.f32 0.5, %v896_v47 }
 0x90b   : > { %v903_v54 = vmul.f32 %v901_v53, %v897_v49 }
 0x977   : > { %v906_v50 = vpop.permute.xlu0 %905 }
 0x978   : > { %v908_v51 = vmul.f32 %v906_v50, %v897_v49 }
 0x97a   : > { %910 = vrot.lane.b32.xlu0 %v908_v51, %s1837_s18 }
 0x97e   : > { %925 = vperm.xlu0 %1727, %v923_v52  }
 0x9ec   : > { %v911_v55 = vpop.permute.xlu0 %910 }
 0x9ed   : > { %v913_v56 = vadd.f32 %v911_v55, %v903_v54 }
 0x9ef   : > { %1755 = vtanh.f32 %v913_v56  ;;  %934 = vrot.lane.b32.xlu0 %v913_v56, %s1840_s28 }
 0x9f9   : > { %v926_v58 = vpop.permute.xlu0 %925 }
 0x9fa   : > { %vm927_vm12 = vcmp.eq.s32.totalorder %v926_v58, 1  ;;  %v440_v58 = vadd.f32 %v2009_v9, %v1955_v11 }
 0x9fc   : > { %v1756_v57 = vpop.eup %1755 }
 0x9fd   : > { %916 = vrot.lane.b32.xlu1 %v1756_v57, %s1837_s18 }
 0xa61   : > { %v935_v59 = vpop.permute.xlu0 %934 }
 0xa62   : > { %v937_v60 = vsel %vm927_vm12, %v935_v59, %v816_v34 }
 0xa63   : > { %1021 = vrot.lane.b32.xlu0 %v937_v60, %s1837_s18 }
 0xa6f   : > { %v917_v61 = vpop.permute.xlu1 %916 }
 0xa70   : > { %v919_v62 = vmul.f32 %v917_v61, %v897_v49 }
 0xa72   : > { %929 = vrot.lane.b32.xlu1 %v919_v62, %s1839_s27 }
 0xad5   : > { %v1022_v21 = vpop.permute.xlu0 %1021 }
 0xae4   : > { %v930_v63 = vpop.permute.xlu1 %929 }
 0xae5   : > { %v932_v0 = vsel %vm927_vm12, %v930_v63, %v811_v38  ;;  %v938_v1 = vsel %vm927_vm12, %v930_v63, 0.0 }
 0xae6   : > { %1577 = vst.msk [vmem:[%s1911_s10 + $0xc] sm:$0xf] %vm576_vm6, %v938_v1  ;;  %1665 = vmatmul.mubr.msk.f32.vlgmr.msra.gmra.mxu0 %vm457_vm3, %v932_v0 }
 0xae7   : > { %1675 = vmatpush3.msra.mxu0 %v1923_v6  ;;  %1678 = vmatprep.mubr.msk.f32.mxu0 %vm1835_vm2, %v1834_v4 }
 0xae8   : > { %1676 = vmatprep.subr.mxu0 %v1834_v4 }
 0xae9   : > { %1677 = vmatpush3.msra.mxu0 %v1926_v8 }
 0xba6   : > { %v1010_v3 = vpop.f32.mrf.mxu0 }
 0xba7   : > { %v1014_v5 = vadd.f32 %v1010_v3, %v435_v2  ;;  %v1284_v2 = vstv %s1283_s11 }
 0xba8   : > { %v1666_v7 = vpop.f32.mrf.mxu0  ;;  %vm1285_vm1 = vcmp.lt.s32.totalorder %v1284_v2, %v1964_v25 }
 0xba9   : > { %1757 = vtanh.f32 %v1014_v5  ;;  %v1015_v14 = vmul.f32 0.5, %v1014_v5  ;;  %v1286_v11 = vsel %vm1285_vm1, 1, %v1838_v27 }
 0xbab   : > { %1759 = vtanh.f32 %v1015_v14 }
 0xbb6   : > { %v1758_v13 = vpop.eup %1757 }
 0xbb7   : > { %1026 = vrot.lane.b32.xlu1 %v1758_v13, %s1836_s17 }
 0xbb8   : > { %v1760_v15 = vpop.eup %1759 }
 0xbb9   : > { %v1017_v16 = vadd.f32 1.0, %v1760_v15 }
 0xbbb   : > { %v1018_v18 = vmul.f32 0.5, %v1017_v16 }
 0xbbd   : > { %v1024_v22 = vmul.f32 %v1022_v21, %v1018_v18 }
 0xc29   : > { %v1027_v19 = vpop.permute.xlu1 %1026 }
 0xc2a   : > { %v1029_v20 = vmul.f32 %v1027_v19, %v1018_v18 }
 0xc2c   : > { %1031 = vrot.lane.b32.xlu1 %v1029_v20, %s1837_s18 }
 0xc30   : > { %1046 = vperm.xlu1 %1728, %v1044_v12  }
 0xc9e   : > { %v1032_v23 = vpop.permute.xlu1 %1031 }
 0xc9f   : > { %v1034_v24 = vadd.f32 %v1032_v23, %v1024_v22 }
 0xca1   : > { %1761 = vtanh.f32 %v1034_v24  ;;  %1055 = vrot.lane.b32.xlu1 %v1034_v24, %s1840_s28  ;;  %v450_v24 = vcombine.high %v440_v58, %v440_v58 }
 0xcab   : > { %v1047_v26 = vpop.permute.xlu1 %1046 }
 0xcac   : > { %vm1048_vm14 = vcmp.eq.s32.totalorder %v1047_v26, 1 }
 0xcae   : > { %v1762_v10 = vpop.eup %1761 }
 0xcaf   : > { %1037 = vrot.lane.b32.xlu0 %v1762_v10, %s1837_s18 }
 0xd13   : > { %v1056_v28 = vpop.permute.xlu1 %1055 }
 0xd14   : > { %v1058_v29 = vsel %vm1048_vm14, %v1056_v28, %v937_v60 }
 0xd15   : > { %1142 = vrot.lane.b32.xlu1 %v1058_v29, %s1837_s18 }
 0xd21   : > { %v1038_v30 = vpop.permute.xlu0 %1037 }
 0xd22   : > { %v1040_v31 = vmul.f32 %v1038_v30, %v1018_v18 }
 0xd24   : > { %1050 = vrot.lane.b32.xlu0 %v1040_v31, %s1839_s27 }
 0xd96   : > { %v1051_v32 = vpop.permute.xlu0 %1050 }
 0xd97   : > { %v1053_v33 = vsel %vm1048_vm14, %v1051_v32, %v932_v0  ;;  %v1059_v34 = vsel %vm1048_vm14, %v1051_v32, 0.0 }
 0xd98   : > { %1579 = vst.msk [vmem:[%s1911_s10 + $0x10] sm:$0xf] %vm576_vm6, %v1059_v34  ;;  %1672 = vmatmul.mubr.msk.f32.vlgmr.msra.gmra.mxu1 %vm457_vm3, %v1053_v33 }
 0xd99   : > { %1682 = vmatpush3.msra.mxu1 %v1923_v6  ;;  %1685 = vmatprep.mubr.msk.f32.mxu1 %vm1835_vm2, %v1834_v4  ;;  %v1163_v6 = vstv %s1162_s9 }
 0xd9a   : > { %1683 = vmatprep.subr.mxu1 %v1834_v4  ;;  %vm1164_vm15 = vcmp.lt.s32.totalorder %v1163_v6, %v1964_v25 }
 0xd9b   : > { %1684 = vmatpush3.msra.mxu1 %v1926_v8  ;;  %v1165_v4 = vsel %vm1164_vm15, 1, %v1838_v27  ;;  %v1143_v8 = vpop.permute.xlu1 %1142 }
 0xe58   : > { %v1131_v36 = vpop.f32.mrf.mxu1 }
 0xe59   : > { %v1135_v37 = vadd.f32 %v1131_v36, %v449_v35 }
 0xe5a   : > { %v1673_v38 = vpop.f32.mrf.mxu1 }
 0xe5b   : > { %1763 = vtanh.f32 %v1135_v37  ;;  %v1136_v40 = vmul.f32 0.5, %v1135_v37 }
 0xe5d   : > { %1765 = vtanh.f32 %v1136_v40 }
 0xe68   : > { %v1764_v39 = vpop.eup %1763 }
 0xe69   : > { %1147 = vrot.lane.b32.xlu0 %v1764_v39, %s1836_s17 }
 0xe6a   : > { %v1766_v41 = vpop.eup %1765 }
 0xe6b   : > { %v1138_v42 = vadd.f32 1.0, %v1766_v41 }
 0xe6d   : > { %v1139_v43 = vmul.f32 0.5, %v1138_v42 }
 0xe6f   : > { %v1145_v46 = vmul.f32 %v1143_v8, %v1139_v43 }
 0xedb   : > { %v1148_v44 = vpop.permute.xlu0 %1147 }
 0xedc   : > { %v1150_v45 = vmul.f32 %v1148_v44, %v1139_v43 }
 0xede   : > { %1152 = vrot.lane.b32.xlu0 %v1150_v45, %s1837_s18 }
 0xee2   : > { %1167 = vperm.xlu0 %1727, %v1165_v4  }
 0xf50   : > { %v1153_v47 = vpop.permute.xlu0 %1152 }
 0xf51   : > { %v1155_v48 = vadd.f32 %v1153_v47, %v1145_v46 }
 0xf53   : > { %1767 = vtanh.f32 %v1155_v48  ;;  %1176 = vrot.lane.b32.xlu0 %v1155_v48, %s1840_s28 }
 0xf5d   : > { %v1168_v50 = vpop.permute.xlu0 %1167 }
 0xf5e   : > { %vm1169_vm0 = vcmp.eq.s32.totalorder %v1168_v50, 1 }
 0xf60   : > { %v1768_v49 = vpop.eup %1767 }
 0xf61   : > { %1158 = vrot.lane.b32.xlu1 %v1768_v49, %s1837_s18 }
 0xfc5   : > { %v1177_v51 = vpop.permute.xlu0 %1176 }
 0xfc6   : > { %v1179_v52 = vsel %vm1169_vm0, %v1177_v51, %v1058_v29 }
 0xfc7   : > { %1263 = vrot.lane.b32.xlu0 %v1179_v52, %s1837_s18 }
 0xfd3   : > { %v1159_v53 = vpop.permute.xlu1 %1158 }
 0xfd4   : > { %v1161_v54 = vmul.f32 %v1159_v53, %v1139_v43 }
 0xfd6   : > { %1171 = vrot.lane.b32.xlu1 %v1161_v54, %s1839_s27 }
0x1039   : > { %v1264_v9 = vpop.permute.xlu0 %1263 }
0x1048   : > { %v1172_v55 = vpop.permute.xlu1 %1171 }
0x1049   : > { %v1174_v56 = vsel %vm1169_vm0, %v1172_v55, %v1053_v33  ;;  %v1180_v57 = vsel %vm1169_vm0, %v1172_v55, 0.0  ;;  %v1405_v33 = vstv %s1404_s12 }
0x104a   : > { %1581 = vst.msk [vmem:[%s1911_s10 + $0x14] sm:$0xf] %vm576_vm6, %v1180_v57  ;;  %1679 = vmatmul.mubr.msk.f32.vlgmr.msra.gmra.mxu0 %vm457_vm3, %v1174_v56  ;;  %vm1406_vm4 = vcmp.lt.s32.totalorder %v1405_v33, %v1964_v25 }
0x104b   : > { %v1407_v37 = vsel %vm1406_vm4, 1, %v1838_v27 }
0x110a   : > { %v1252_v59 = vpop.f32.mrf.mxu0 }
0x110b   : > { %v1256_v60 = vadd.f32 %v1252_v59, %v440_v58 }
0x110c   : > { %v1680_v61 = vpop.f32.mrf.mxu0 }
0x110d   : > { %1769 = vtanh.f32 %v1256_v60  ;;  %v1257_v63 = vmul.f32 0.5, %v1256_v60 }
0x110f   : > { %1771 = vtanh.f32 %v1257_v63 }
0x111a   : > { %v1770_v62 = vpop.eup %1769 }
0x111b   : > { %1268 = vrot.lane.b32.xlu1 %v1770_v62, %s1836_s17 }
0x111c   : > { %v1772_v0 = vpop.eup %1771 }
0x111d   : > { %v1259_v1 = vadd.f32 1.0, %v1772_v0 }
0x111f   : > { %v1260_v3 = vmul.f32 0.5, %v1259_v1 }
0x1121   : > { %v1266_v13 = vmul.f32 %v1264_v9, %v1260_v3 }
0x118d   : > { %v1269_v5 = vpop.permute.xlu1 %1268 }
0x118e   : > { %v1271_v7 = vmul.f32 %v1269_v5, %v1260_v3 }
0x1190   : > { %1273 = vrot.lane.b32.xlu1 %v1271_v7, %s1837_s18 }
0x1194   : > { %1288 = vperm.xlu1 %1728, %v1286_v11  }
0x1202   : > { %v1274_v14 = vpop.permute.xlu1 %1273 }
0x1203   : > { %v1276_v15 = vadd.f32 %v1274_v14, %v1266_v13 }
0x1205   : > { %1773 = vtanh.f32 %v1276_v15  ;;  %1297 = vrot.lane.b32.xlu1 %v1276_v15, %s1840_s28 }
0x120f   : > { %v1289_v17 = vpop.permute.xlu1 %1288 }
0x1210   : > { %vm1290_vm2 = vcmp.eq.s32.totalorder %v1289_v17, 1 }
0x1212   : > { %v1774_v16 = vpop.eup %1773 }
0x1213   : > { %1279 = vrot.lane.b32.xlu0 %v1774_v16, %s1837_s18 }
0x1277   : > { %v1298_v18 = vpop.permute.xlu1 %1297 }
0x1278   : > { %v1300_v19 = vsel %vm1290_vm2, %v1298_v18, %v1179_v52 }
0x1279   : > { %1384 = vrot.lane.b32.xlu1 %v1300_v19, %s1837_s18 }
0x1285   : > { %v1280_v20 = vpop.permute.xlu0 %1279 }
0x1286   : > { %v1282_v12 = vmul.f32 %v1280_v20, %v1260_v3 }
0x1288   : > { %1292 = vrot.lane.b32.xlu0 %v1282_v12, %s1839_s27 }
0x12eb   : > { %v1385_v38 = vpop.permute.xlu1 %1384 }
0x12fa   : > { %v1293_v21 = vpop.permute.xlu0 %1292 }
0x12fb   : > { %v1295_v22 = vsel %vm1290_vm2, %v1293_v21, %v1174_v56  ;;  %v1301_v23 = vsel %vm1290_vm2, %v1293_v21, 0.0 }
0x12fc   : > { %1583 = vst.msk [vmem:[%s1911_s10 + $0x18] sm:$0xf] %vm576_vm6, %v1301_v23  ;;  %1686 = vmatmul.mubr.msk.f32.vlgmr.msra.gmra.mxu1 %vm457_vm3, %v1295_v22 }
0x13bc   : > { %v1373_v10 = vpop.f32.mrf.mxu1 }
0x13bd   : > { %v1377_v26 = vadd.f32 %v1373_v10, %v450_v24 }
0x13be   : > { %v1687_v28 = vpop.f32.mrf.mxu1 }
0x13bf   : > { %1775 = vtanh.f32 %v1377_v26  ;;  %v1378_v30 = vmul.f32 0.5, %v1377_v26 }
0x13c1   : > { %1777 = vtanh.f32 %v1378_v30 }
0x13cc   : > { %v1776_v29 = vpop.eup %1775 }
0x13cd   : > { %1389 = vrot.lane.b32.xlu0 %v1776_v29, %s1836_s17 }
0x13ce   : > { %v1778_v31 = vpop.eup %1777 }
0x13cf   : > { %v1380_v32 = vadd.f32 1.0, %v1778_v31 }
0x13d1   : > { %v1381_v34 = vmul.f32 0.5, %v1380_v32 }
0x13d3   : > { %v1387_v39 = vmul.f32 %v1385_v38, %v1381_v34 }
0x143f   : > { %v1390_v35 = vpop.permute.xlu0 %1389 }
0x1440   : > { %v1392_v36 = vmul.f32 %v1390_v35, %v1381_v34 }
0x1442   : > { %1394 = vrot.lane.b32.xlu0 %v1392_v36, %s1837_s18 }
0x1446   : > { %1409 = vperm.xlu0 %1727, %v1407_v37  }
0x14b4   : > { %v1395_v40 = vpop.permute.xlu0 %1394 }
0x14b5   : > { %v1397_v41 = vadd.f32 %v1395_v40, %v1387_v39 }
0x14b7   : > { %1779 = vtanh.f32 %v1397_v41  ;;  %1418 = vrot.lane.b32.xlu0 %v1397_v41, %s1840_s28 }
0x14c1   : > { %v1410_v6 = vpop.permute.xlu0 %1409 }
0x14c2   : > { %vm1411_vm3 = vcmp.eq.s32.totalorder %v1410_v6, 1 }
0x14c4   : > { %v1780_v42 = vpop.eup %1779 }
0x14c5   : > { %1400 = vrot.lane.b32.xlu1 %v1780_v42, %s1837_s18 }
0x1529   : > { %v1419_v43 = vpop.permute.xlu0 %1418 }
0x152a   : > { %v1421_v25 = vsel %vm1411_vm3, %v1419_v43, %v1300_v19 }
0x152b   : > { %1426 = vst.msk [vmem:[#allocation3] sm:$0xf] %vm576_vm6, %v1421_v25 }
0x1537   : > { %v1401_v44 = vpop.permute.xlu1 %1400 }
0x1538   : > { %v1403_v27 = vmul.f32 %v1401_v44, %v1381_v34 }
0x153a   : > { %1413 = vrot.lane.b32.xlu1 %v1403_v27, %s1839_s27 }
0x15aa   : > { %1430 = sbr.rel (%p1586_p6) target bundleno = 5559 (0x15b7), region = 48 }
0x15ac   : > { %v1414_v45 = vpop.permute.xlu1 %1413 }
0x15ad   : > { %v1416_v4 = vsel %vm1411_vm3, %v1414_v45, %v1295_v22  ;;  %v1422_v8 = vsel %vm1411_vm3, %v1414_v45, 0.0 }
0x15ae   : > { %1585 = vst.msk [vmem:[%s1911_s10 + $0x1c] sm:$0xf] %vm576_vm6, %v1422_v8  ;;  %1425 = vst.msk [vmem:[#allocation2] sm:$0xf] %vm576_vm6, %v1416_v4 }
0x15b5   : > { %v1431_v46 = vld [vmem:[#allocation2] sm:$0xf] }
0x15b6   : > { %1432 = vst.msk [vmem:[#allocation4] sm:$0xf] %vm576_vm6, %v1431_v46 }
0x15b7 PF: > { %p2111_p7 = scmp.eq.s32.totalorder %s1554_s24, 1  ;;  %s1841_s13 = smov [#allocation4]  }
0x15b8   : > { %s1454_s14 = sshll.u32 %s1841_s13, 4  ;;  %s1455_s14 = int_to_ptr.vmem [resolvable:$true] %s1454_s14 }
0x15b9   : > { %s1781_s10 = scalar_lea.vmem %s1455_s14, 64  ;;  %p1788_p11 = scmp.lt.s32.totalorder %s1455_s14, %s1455_s14 }
0x15ba   : > { %p1782_p8 = scmp.ne.s32.totalorder %s1455_s14, %s1781_s10  ;;  %p1789_p12 = scmp.lt.s32.totalorder %s1781_s10, %s1781_s10 }
0x15bc   : > { %p1783_p9 = pnand %p1782_p8, %p2111_p7  ;;  %p1790_p13 = por %p1789_p12, %p1788_p11 }
0x15be   : > { %p1784_p10 = pneg %p1783_p9 }
0x15c0   : > { %p1791_p0 = pnand %p1790_p13, %p1784_p10 }
0x15c2   : > { %1794 = shalt.err (!%p1791_p0)
}
0x15c3   : > { %1689 = dma.vmem_to_hbm [thread:$0]  (%p2111_p7), %s1455_s14, 64, %s2141_s6, [#allocation5]  }
0x15c4   : > { %1818 = dma.done.wait (%p2111_p7), [#allocation5], 64  }
0x15c5   : > { %1820 = vsyncadd (%p2111_p7), [#allocation5], 4294967232 }
0x15c6 PF: > { %s18_s23 = sadd.s32 1, %s1831_s23   ;;  %s2143_s21 = smov %s1827_s22 }
0x15c7   : > { %p15_p1 = scmp.ge.s32.totalorder %s18_s23, 4   ;;  %s2144_s22 = smov %s2146_s25 }
0x15c9   :  { %17 = sbr.rel (!%p15_p1) target bundleno = 2 (0x2), region = 98 }
0x15ce   :  { %1478 = vsyncpa [#allocation5], 1 }
0x15cf   :  { %1480 = vsyncpa [#allocation5 + $0x1], 1 }

// kernel: fast_uni_lstm_forward.3
= control target key start
LH: loop header
LB: loop body
LE: loop exit
PB: predicated region body
PF: predicated region fallthrough
CT: control target
= control target key end

     0   :  { %12 = vsyncpa [#allocation5], 0  ;;  %s1941_s21 = smov 0   ;;  %s1943_s22 = smov 0   ;;  %s2243_s0 = inlined_call_operand.vmem [shape: s32[4,1], index: 0, kind: input, shape index: {}]   ;;  %s2244_s1 = inlined_call_operand.vmem [shape: f32[16,4,16], index: 1, kind: input, shape index: {}]   ;;  %s2245_s2 = inlined_call_operand.vmem [shape: bf16[16,128], index: 2, kind: input, shape index: {}]   ;;  %s2246_s3 = inlined_call_operand.vmem [shape: bf16[32,128], index: 3, kind: input, shape index: {}]   ;;  %s2247_s4 = inlined_call_operand.vmem [shape: f32[1,128], index: 4, kind: input, shape index: {}]   ;;  %s2248_s5 = inlined_call_operand.vmem [shape: f32[16,4,32], index: 5, kind: output, shape index: {0}]   ;;  %s2249_s6 = inlined_call_operand.hbm [shape: f32[4,32], index: 6, kind: output, shape index: {1}]  }
   0x1   :  { %s1945_s23 = smov 0  }
   0x2 LB: > { %s1560_s24 = sadd.s32 4294967295, %s1896_s23   ;;  %s27_s25 = sadd.s32 1, %s1892_s22  ;;  %s1896_s23 = sphi %s1945_s23, %s18_s23   ;;  %s1892_s22 = sphi %s1943_s22, %s2252_s22   ;;  %s1888_s21 = sphi %s1941_s21, %s2251_s21  }
   0x3   : > { %p28_p0 = scmp.ge.s32.totalorder %s27_s25, 2  ;;  %p1565_p1 = scmp.ge.s32.totalorder %s1896_s23, 1 }
   0x4   : > { %p245_p2 = scmp.lt.s32.totalorder %s1896_s23, 3 }
   0x5   : > { %s2254_s25 = smov (%p28_p0, %s27_s25), 0 }
   0x6   : > { %p246_p3 = pnand %p1565_p1, %p245_p2 }
   0x7   : > { %s1963_s26 = sshll.u32 (!%p246_p3), %s1888_s21, 3  ;;  %p1570_p5 = scmp.ne.s32.totalorder (!%p246_p3), %s1888_s21, 0 }
   0x8   : > { %249 = sbr.rel (%p246_p3) target bundleno = 5576 (0x15c8), region = 40  ;;  %p290_p4 = scmp.lt.s32.totalorder (!%p246_p3), %s1963_s26, 15 }
   0xd   : > { %s291_s27 = scalar_select %p290_p4, %s1963_s26, 15 }
   0xe   : > { %310 = sbr.rel (%p1570_p5) target bundleno = 21 (0x15), region = 44 }
   0xf   : > { %s1567_s28 = sshll.u32 %s291_s27, 2 }
  0x10   : > { %s1970_s7 = scalar_lea.vmem %s2244_s1, %s1567_s28  ;;  %s1975_s10 = scalar_lea.vmem %s2248_s5, %s1567_s28 }
  0x13   : > { %vm311_vm0 = vcmask 257024   ;;  %v1898_v0 = vmov 0.0  }
  0x14   : > { %312 = vst.msk [vmem:[#allocation2] sm:$0xf] %vm311_vm0, %v1898_v0  ;;  %313 = vst.msk [vmem:[#allocation3] sm:$0xf] %vm311_vm0, %v1898_v0 }
  0x15 PF: > { %v1598_v1 = vld [vmem:[%s2245_s2] sm:$0xff]   ;;  %v1609_v2 = vld [vmem:[%s2246_s3 + $0x8] sm:$0xff]   ;;  %v1899_v3 = vmov 0.0   ;;  %vm355_vm1 = vcmask 130048   ;;  %vm1900_vm2 = vmmov 0   ;;  %vm463_vm3 = vcmask 261120  }
  0x16   : > { %1666 = vmatprep.subr.mxu1 %v1899_v3  ;;  %v1599_v4 = vunpack.c.l.bf16 %v1598_v1  ;;  %v1600_v5 = vunpack.c.h.bf16 %v1598_v1  ;;  %v1985_v6 = vunpack.c.h.bf16 %v1609_v2  ;;  %v1987_v7 = vunpack.c.l.bf16 %v1609_v2  ;;  %v1794_v8 = vld [vmem:[%s1970_s7] sm:$0xff]   ;;  %v1795_v10 = vld [vmem:[%s1970_s7 + $0x8] sm:$0xff]   ;;  %1674 = vmatprep.mubr.msk.f32.mxu1 %vm1900_vm2, %v1899_v3  ;;  %s1901_s19 = smov 32   ;;  %v1796_v37 = vld [vmem:[%s1970_s7 + $0x10] sm:$0xff]   ;;  %s1903_s28 = smov 64  }
  0x17   : > { %v1602_v9 = vld [vmem:[%s2246_s3] sm:$0xff]   ;;  %1660 = vmatprep.mubr.msk.f32.mxu0 %vm355_vm1, %v1794_v8  ;;  %v564_v30 = vstv %s1963_s26  ;;  %v1902_v31 = vmov 0   ;;  %v1797_v38 = vld [vmem:[%s1970_s7 + $0x18] sm:$0xff]   ;;  %s1904_s29 = smov 96   ;;  %vm582_vm6 = vcmask 257024   ;;  %s684_s30 = sadd.s32 1, %s1963_s26 }
  0x18   : > { %1656 = vmatprep.subr.mxu0 %v1600_v5  ;;  %1667 = vmatpush3.msra.mxu1 %v1985_v6  ;;  %v1996_v11 = vunpack.c.h.bf16 %v1602_v9  ;;  %v2000_v12 = vunpack.c.l.bf16 %v1602_v9  ;;  %v2038_v15 = vld [vmem:[%s2247_s4] ss:$0 sm:$0xff]  ;;  %v685_v58 = vstv %s684_s30  ;;  %s805_s7 = sadd.s32 2, %s1963_s26  ;;  %s926_s8 = sadd.s32 3, %s1963_s26 }
  0x19   : > { %1657 = vmatpush3.msra.mxu0 %v1600_v5  ;;  %1668 = vmatprep.subr.mxu1 %v1899_v3  ;;  %v2050_v29 = vld [vmem:[%s2243_s0] sm:$0xf]  ;;  %s1047_s9 = sadd.s32 4, %s1963_s26  ;;  %s1168_s11 = sadd.s32 5, %s1963_s26 }
  0x1a   : > { %1658 = vmatprep.subr.mxu0 %v1599_v4  ;;  %1669 = vmatpush3.msra.mxu1 %v1987_v7  ;;  %vm565_vm4 = vcmp.lt.s32.totalorder %v564_v30, %v2050_v29  ;;  %vm686_vm7 = vcmp.lt.s32.totalorder %v685_v58, %v2050_v29  ;;  %s1289_s12 = sadd.s32 6, %s1963_s26  ;;  %s1410_s13 = sadd.s32 7, %s1963_s26 }
  0x1b   : > { %1659 = vmatpush3.msra.mxu0 %v1599_v4  ;;  %1670 = vmatprep.subr.mxu1 %v1899_v3  ;;  %v2007_v13 = vld [vmem:[#allocation2] sm:$0xf]  ;;  %v462_v22 = vld [vmem:[#allocation3] sm:$0xf]  ;;  %v566_v32 = vsel %vm565_vm4, 1, %v1902_v31  ;;  %v687_v62 = vsel %vm686_vm7, 1, %v1902_v31 }
  0x1c   : > { %1661 = vmatmul.mubr.msk.f32.vlgmr.msra.gmra.mxu0 %vm355_vm1, %v1795_v10  ;;  %1671 = vmatpush3.msra.mxu1 %v1996_v11  ;;  %p1592_p6 = scmp.ne.s32.totalorder %s1888_s21, 1 }
  0x1d   : > { %1672 = vmatprep.subr.mxu1 %v1899_v3  ;;  %1677 = vmatprep.subr.mxu0 %v1899_v3 }
  0x1e   : > { %1673 = vmatpush3.msra.mxu1 %v2000_v12  ;;  %1678 = vmatpush3.msra.mxu0 %v1985_v6 }
  0x1f   : > { %1675 = vmatmul.mubr.msk.f32.vlgmr.msra.gmra.mxu1 %vm463_vm3, %v2007_v13  ;;  %1679 = vmatprep.subr.mxu0 %v1899_v3 }
  0x20   : > { %1680 = vmatpush3.msra.mxu0 %v1987_v7  ;;  %1688 = vmatprep.subr.mxu1 %v1899_v3 }
  0x21   : > { %1681 = vmatprep.subr.mxu0 %v1899_v3  ;;  %1689 = vmatpush3.msra.mxu1 %v1985_v6 }
  0x22   : > { %1682 = vmatpush3.msra.mxu0 %v1996_v11  ;;  %1690 = vmatprep.subr.mxu1 %v1899_v3 }
  0x23   : > { %1683 = vmatprep.subr.mxu0 %v1899_v3  ;;  %1691 = vmatpush3.msra.mxu1 %v1987_v7 }
  0x24   : > { %1684 = vmatpush3.msra.mxu0 %v2000_v12  ;;  %1692 = vmatprep.subr.mxu1 %v1899_v3 }
  0x25   : > { %1693 = vmatpush3.msra.mxu1 %v1996_v11  ;;  %1696 = vmatprep.mubr.msk.f32.mxu1 %vm1900_vm2, %v1899_v3 }
  0x26   : > { %1694 = vmatprep.subr.mxu1 %v1899_v3  ;;  %1699 = vmatprep.subr.mxu0 %v1899_v3 }
  0x27   : > { %1695 = vmatpush3.msra.mxu1 %v2000_v12  ;;  %1792 = vset.pattern.permute.xlu0 %v1902_v31 }
  0x28   : > { %1710 = vmatprep.subr.mxu1 %v1899_v3  ;;  %1793 = vset.pattern.permute.xlu1 %v1902_v31 }
  0x29   : > { %1663 = vmatprep.mubr.msk.f32.mxu0 %vm355_vm1, %v1796_v37 }
  0x2a   : > { %1664 = vmatmul.mubr.msk.f32.gmra.mxu0 %vm355_vm1, %v1797_v38 }
  0x2b   : > { %1685 = vmatprep.mubr.msk.f32.mxu0 %vm1900_vm2, %v1899_v3 }
  0xdc   : > { %v2033_v14 = vpop.f32.mrf.mxu0 }
  0xde   : > { %v430_v16 = vpop.f32.mrf.mxu0 }
  0xdf   : > { %v2041_v17 = vadd.f32 %v2038_v15, %v430_v16  ;;  %v533_v18 = vpop.f32.mrf.mxu1 }
  0xe1   : > { %v537_v19 = vadd.f32 %v533_v18, %v2041_v17  ;;  %v1676_v20 = vpop.f32.mrf.mxu1  ;;  %v453_v50 = vcombine.high %v2041_v17, %v2041_v17 }
  0xe3   : > { %1798 = vtanh.f32 %v537_v19  ;;  %v538_v23 = vmul.f32 0.5, %v537_v19  ;;  %v436_v19 = vadd.f32 %v2033_v14, %v2038_v15 }
  0xe5   : > { %1800 = vtanh.f32 %v538_v23 }
  0xea   : > { %v2081_v48 = vpop.f32.mrf.mxu0 }
  0xec   : > { %v2083_v49 = vpop.f32.mrf.mxu0 }
  0xf0   : > { %v1799_v21 = vpop.eup %1798 }
  0xf1   : > { %549 = vrot.lane.b32.xlu0 %v1799_v21, %s1901_s19 }
  0xf2   : > { %v1801_v24 = vpop.eup %1800 }
  0xf3   : > { %v540_v25 = vadd.f32 1.0, %v1801_v24 }
  0xf5   : > { %544 = vrot.lane.b32.xlu0 %v462_v22, %s1901_s19  ;;  %v541_v26 = vmul.f32 0.5, %v540_v25 }
  0xf9   : > { %568 = vperm.xlu0 %1792, %v566_v32  }
 0x163   : > { %v550_v27 = vpop.permute.xlu0 %549 }
 0x164   : > { %v552_v28 = vmul.f32 %v550_v27, %v541_v26  ;;  %v806_v27 = vstv %s805_s7 }
 0x165   : > { %vm807_vm9 = vcmp.lt.s32.totalorder %v806_v27, %v2050_v29 }
 0x166   : > { %554 = vrot.lane.b32.xlu1 %v552_v28, %s1901_s19  ;;  %v808_v14 = vsel %vm807_vm9, 1, %v1902_v31 }
 0x167   : > { %v545_v33 = vpop.permute.xlu0 %544 }
 0x168   : > { %v547_v34 = vmul.f32 %v545_v33, %v541_v26 }
 0x174   : > { %v569_v42 = vpop.permute.xlu0 %568 }
 0x175   : > { %vm570_vm5 = vcmp.eq.s32.totalorder %v569_v42, 1 }
 0x1d8   : > { %v555_v35 = vpop.permute.xlu1 %554 }
 0x1d9   : > { %v557_v36 = vadd.f32 %v555_v35, %v547_v34 }
 0x1db   : > { %1802 = vtanh.f32 %v557_v36 }
 0x1e8   : > { %v1803_v39 = vpop.eup %1802 }
 0x1e9   : > { %560 = vrot.lane.b32.xlu1 %v1803_v39, %s1901_s19 }
 0x25b   : > { %v561_v40 = vpop.permute.xlu1 %560 }
 0x25c   : > { %v563_v41 = vmul.f32 %v561_v40, %v541_v26 }
 0x25e   : > { %572 = vrot.lane.b32.xlu1 %v563_v41, %s1903_s28 }
 0x262   : > { %577 = vrot.lane.b32.xlu1 %v557_v36, %s1904_s29 }
 0x2d0   : > { %v573_v43 = vpop.permute.xlu1 %572 }
 0x2d1   : > { %v575_v44 = vsel %vm570_vm5, %v573_v43, %v2007_v13  ;;  %v581_v45 = vsel %vm570_vm5, %v573_v43, 0.0 }
 0x2d2   : > { %583 = vst.msk [vmem:[%s1975_s10] sm:$0xf] %vm582_vm6, %v581_v45  ;;  %1686 = vmatmul.mubr.msk.f32.vlgmr.msra.gmra.mxu0 %vm463_vm3, %v575_v44 }
 0x2d3   : > { %1700 = vmatpush3.msra.mxu0 %v1985_v6  ;;  %1707 = vmatprep.mubr.msk.f32.mxu0 %vm1900_vm2, %v1899_v3 }
 0x2d4   : > { %v578_v46 = vpop.permute.xlu1 %577  ;;  %1701 = vmatprep.subr.mxu0 %v1899_v3 }
 0x2d5   : > { %v580_v47 = vsel %vm570_vm5, %v578_v46, %v462_v22  ;;  %1702 = vmatpush3.msra.mxu0 %v1987_v7  ;;  %v454_v46 = vcombine.high %v436_v19, %v436_v19 }
 0x2d6   : > { %664 = vrot.lane.b32.xlu1 %v580_v47, %s1901_s19  ;;  %1703 = vmatprep.subr.mxu0 %v1899_v3 }
 0x2d7   : > { %1704 = vmatpush3.msra.mxu0 %v1996_v11 }
 0x2d8   : > { %1705 = vmatprep.subr.mxu0 %v1899_v3 }
 0x2d9   : > { %1706 = vmatpush3.msra.mxu0 %v2000_v12 }
 0x2da   : > { %1721 = vmatprep.subr.mxu0 %v1899_v3 }
 0x348   : > { %v665_v63 = vpop.permute.xlu1 %664 }
 0x392   : > { %v653_v51 = vpop.f32.mrf.mxu0 }
 0x393   : > { %v657_v52 = vadd.f32 %v653_v51, %v453_v50 }
 0x394   : > { %v1687_v53 = vpop.f32.mrf.mxu0 }
 0x395   : > { %1804 = vtanh.f32 %v657_v52  ;;  %v658_v55 = vmul.f32 0.5, %v657_v52 }
 0x397   : > { %1806 = vtanh.f32 %v658_v55 }
 0x3a2   : > { %v1805_v54 = vpop.eup %1804 }
 0x3a3   : > { %669 = vrot.lane.b32.xlu0 %v1805_v54, %s1901_s19 }
 0x3a4   : > { %v1807_v56 = vpop.eup %1806 }
 0x3a5   : > { %v660_v57 = vadd.f32 1.0, %v1807_v56  ;;  %v927_v56 = vstv %s926_s8 }
 0x3a6   : > { %vm928_vm11 = vcmp.lt.s32.totalorder %v927_v56, %v2050_v29 }
 0x3a7   : > { %v661_v59 = vmul.f32 0.5, %v660_v57 }
 0x3a9   : > { %v667_v0 = vmul.f32 %v665_v63, %v661_v59 }
 0x415   : > { %v670_v60 = vpop.permute.xlu0 %669 }
 0x416   : > { %v672_v61 = vmul.f32 %v670_v60, %v661_v59  ;;  %v929_v60 = vsel %vm928_vm11, 1, %v1902_v31 }
 0x418   : > { %674 = vrot.lane.b32.xlu0 %v672_v61, %s1901_s19 }
 0x41c   : > { %689 = vperm.xlu0 %1792, %v687_v62  }
 0x48a   : > { %v675_v1 = vpop.permute.xlu0 %674 }
 0x48b   : > { %v677_v2 = vadd.f32 %v675_v1, %v667_v0 }
 0x48d   : > { %1808 = vtanh.f32 %v677_v2  ;;  %698 = vrot.lane.b32.xlu0 %v677_v2, %s1904_s29 }
 0x497   : > { %v690_v5 = vpop.permute.xlu0 %689 }
 0x498   : > { %vm691_vm8 = vcmp.eq.s32.totalorder %v690_v5, 1 }
 0x49a   : > { %v1809_v4 = vpop.eup %1808 }
 0x49b   : > { %680 = vrot.lane.b32.xlu1 %v1809_v4, %s1901_s19 }
 0x4ff   : > { %v699_v8 = vpop.permute.xlu0 %698 }
 0x500   : > { %v701_v9 = vsel %vm691_vm8, %v699_v8, %v580_v47 }
 0x501   : > { %785 = vrot.lane.b32.xlu0 %v701_v9, %s1901_s19 }
 0x50d   : > { %v681_v10 = vpop.permute.xlu1 %680 }
 0x50e   : > { %v683_v13 = vmul.f32 %v681_v10, %v661_v59 }
 0x510   : > { %693 = vrot.lane.b32.xlu1 %v683_v13, %s1903_s28 }
 0x573   : > { %v786_v33 = vpop.permute.xlu0 %785 }
 0x582   : > { %v694_v16 = vpop.permute.xlu1 %693 }
 0x583   : > { %v696_v17 = vsel %vm691_vm8, %v694_v16, %v575_v44  ;;  %v702_v18 = vsel %vm691_vm8, %v694_v16, 0.0 }
 0x584   : > { %1579 = vst.msk [vmem:[%s1975_s10 + $0x4] sm:$0xf] %vm582_vm6, %v702_v18  ;;  %1697 = vmatmul.mubr.msk.f32.vlgmr.msra.gmra.mxu1 %vm463_vm3, %v696_v17 }
 0x585   : > { %1711 = vmatpush3.msra.mxu1 %v1985_v6  ;;  %1718 = vmatprep.mubr.msk.f32.mxu1 %vm1900_vm2, %v1899_v3 }
 0x586   : > { %1712 = vmatprep.subr.mxu1 %v1899_v3 }
 0x587   : > { %1713 = vmatpush3.msra.mxu1 %v1987_v7 }
 0x588   : > { %1714 = vmatprep.subr.mxu1 %v1899_v3 }
 0x589   : > { %1715 = vmatpush3.msra.mxu1 %v1996_v11 }
 0x58a   : > { %1716 = vmatprep.subr.mxu1 %v1899_v3 }
 0x58b   : > { %1717 = vmatpush3.msra.mxu1 %v2000_v12 }
 0x58c   : > { %1732 = vmatprep.subr.mxu1 %v1899_v3 }
 0x644   : > { %v774_v20 = vpop.f32.mrf.mxu1 }
 0x645   : > { %v778_v21 = vadd.f32 %v774_v20, %v436_v19 }
 0x646   : > { %v1698_v22 = vpop.f32.mrf.mxu1 }
 0x647   : > { %1810 = vtanh.f32 %v778_v21  ;;  %v779_v24 = vmul.f32 0.5, %v778_v21 }
 0x649   : > { %1812 = vtanh.f32 %v779_v24 }
 0x654   : > { %v1811_v23 = vpop.eup %1810 }
 0x655   : > { %790 = vrot.lane.b32.xlu1 %v1811_v23, %s1901_s19 }
 0x656   : > { %v1813_v25 = vpop.eup %1812 }
 0x657   : > { %v781_v26 = vadd.f32 1.0, %v1813_v25  ;;  %v1048_v25 = vstv %s1047_s9 }
 0x658   : > { %vm1049_vm13 = vcmp.lt.s32.totalorder %v1048_v25, %v2050_v29 }
 0x659   : > { %v782_v28 = vmul.f32 0.5, %v781_v26 }
 0x65b   : > { %v788_v34 = vmul.f32 %v786_v33, %v782_v28 }
 0x6c7   : > { %v791_v30 = vpop.permute.xlu1 %790 }
 0x6c8   : > { %v793_v32 = vmul.f32 %v791_v30, %v782_v28 }
 0x6ca   : > { %795 = vrot.lane.b32.xlu1 %v793_v32, %s1901_s19 }
 0x6ce   : > { %810 = vperm.xlu1 %1793, %v808_v14  }
 0x73c   : > { %v796_v35 = vpop.permute.xlu1 %795 }
 0x73d   : > { %v798_v36 = vadd.f32 %v796_v35, %v788_v34 }
 0x73f   : > { %1814 = vtanh.f32 %v798_v36  ;;  %819 = vrot.lane.b32.xlu1 %v798_v36, %s1904_s29 }
 0x749   : > { %v811_v38 = vpop.permute.xlu1 %810 }
 0x74a   : > { %vm812_vm10 = vcmp.eq.s32.totalorder %v811_v38, 1 }
 0x74c   : > { %v1815_v37 = vpop.eup %1814 }
 0x74d   : > { %801 = vrot.lane.b32.xlu0 %v1815_v37, %s1901_s19 }
 0x7b1   : > { %v820_v39 = vpop.permute.xlu1 %819 }
 0x7b2   : > { %v822_v40 = vsel %vm812_vm10, %v820_v39, %v701_v9 }
 0x7b3   : > { %906 = vrot.lane.b32.xlu1 %v822_v40, %s1901_s19 }
 0x7bf   : > { %v802_v41 = vpop.permute.xlu0 %801 }
 0x7c0   : > { %v804_v42 = vmul.f32 %v802_v41, %v782_v28 }
 0x7c2   : > { %814 = vrot.lane.b32.xlu0 %v804_v42, %s1903_s28 }
 0x825   : > { %v907_v61 = vpop.permute.xlu1 %906 }
 0x834   : > { %v815_v43 = vpop.permute.xlu0 %814 }
 0x835   : > { %v817_v44 = vsel %vm812_vm10, %v815_v43, %v696_v17  ;;  %v823_v45 = vsel %vm812_vm10, %v815_v43, 0.0  ;;  %v441_v17 = vadd.f32 %v2038_v15, %v2083_v49  ;;  %v1050_v49 = vsel %vm1049_vm13, 1, %v1902_v31 }
 0x836   : > { %1581 = vst.msk [vmem:[%s1975_s10 + $0x8] sm:$0xf] %vm582_vm6, %v823_v45  ;;  %1708 = vmatmul.mubr.msk.f32.vlgmr.msra.gmra.mxu0 %vm463_vm3, %v817_v44 }
 0x837   : > { %1722 = vmatpush3.msra.mxu0 %v1985_v6  ;;  %1729 = vmatprep.mubr.msk.f32.mxu0 %vm1900_vm2, %v1899_v3  ;;  %v455_v43 = vcombine.high %v441_v17, %v441_v17 }
 0x838   : > { %1723 = vmatprep.subr.mxu0 %v1899_v3 }
 0x839   : > { %1724 = vmatpush3.msra.mxu0 %v1987_v7 }
 0x83a   : > { %1725 = vmatprep.subr.mxu0 %v1899_v3 }
 0x83b   : > { %1726 = vmatpush3.msra.mxu0 %v1996_v11 }
 0x83c   : > { %1727 = vmatprep.subr.mxu0 %v1899_v3 }
 0x83d   : > { %1728 = vmatpush3.msra.mxu0 %v2000_v12 }
 0x83e   : > { %1743 = vmatprep.subr.mxu0 %v1899_v3 }
 0x8f6   : > { %v895_v47 = vpop.f32.mrf.mxu0 }
 0x8f7   : > { %v899_v50 = vadd.f32 %v895_v47, %v454_v46 }
 0x8f8   : > { %v1709_v51 = vpop.f32.mrf.mxu0 }
 0x8f9   : > { %1816 = vtanh.f32 %v899_v50  ;;  %v900_v53 = vmul.f32 0.5, %v899_v50  ;;  %v1169_v51 = vstv %s1168_s11 }
 0x8fa   : > { %vm1170_vm15 = vcmp.lt.s32.totalorder %v1169_v51, %v2050_v29 }
 0x8fb   : > { %1818 = vtanh.f32 %v900_v53 }
 0x906   : > { %v1817_v52 = vpop.eup %1816 }
 0x907   : > { %911 = vrot.lane.b32.xlu0 %v1817_v52, %s1901_s19 }
 0x908   : > { %v1819_v54 = vpop.eup %1818 }
 0x909   : > { %v902_v55 = vadd.f32 1.0, %v1819_v54 }
 0x90b   : > { %v903_v57 = vmul.f32 0.5, %v902_v55 }
 0x90d   : > { %v909_v62 = vmul.f32 %v907_v61, %v903_v57 }
 0x979   : > { %v912_v58 = vpop.permute.xlu0 %911 }
 0x97a   : > { %v914_v59 = vmul.f32 %v912_v58, %v903_v57 }
 0x97c   : > { %916 = vrot.lane.b32.xlu0 %v914_v59, %s1901_s19 }
 0x980   : > { %931 = vperm.xlu0 %1792, %v929_v60  }
 0x9ee   : > { %v917_v63 = vpop.permute.xlu0 %916 }
 0x9ef   : > { %v919_v0 = vadd.f32 %v917_v63, %v909_v62 }
 0x9f1   : > { %1820 = vtanh.f32 %v919_v0  ;;  %940 = vrot.lane.b32.xlu0 %v919_v0, %s1904_s29 }
 0x9fb   : > { %v932_v2 = vpop.permute.xlu0 %931 }
 0x9fc   : > { %vm933_vm12 = vcmp.eq.s32.totalorder %v932_v2, 1  ;;  %v446_v2 = vadd.f32 %v2081_v48, %v2038_v15 }
 0x9fe   : > { %v1821_v1 = vpop.eup %1820 }
 0x9ff   : > { %922 = vrot.lane.b32.xlu1 %v1821_v1, %s1901_s19 }
 0xa63   : > { %v941_v4 = vpop.permute.xlu0 %940 }
 0xa64   : > { %v943_v5 = vsel %vm933_vm12, %v941_v4, %v822_v40 }
 0xa65   : > { %1027 = vrot.lane.b32.xlu0 %v943_v5, %s1901_s19 }
 0xa71   : > { %v923_v8 = vpop.permute.xlu1 %922 }
 0xa72   : > { %v925_v9 = vmul.f32 %v923_v8, %v903_v57 }
 0xa74   : > { %935 = vrot.lane.b32.xlu1 %v925_v9, %s1903_s28 }
 0xad7   : > { %v1028_v30 = vpop.permute.xlu0 %1027 }
 0xae6   : > { %v936_v10 = vpop.permute.xlu1 %935 }
 0xae7   : > { %v938_v13 = vsel %vm933_vm12, %v936_v10, %v817_v44  ;;  %v944_v16 = vsel %vm933_vm12, %v936_v10, 0.0 }
 0xae8   : > { %1583 = vst.msk [vmem:[%s1975_s10 + $0xc] sm:$0xf] %vm582_vm6, %v944_v16  ;;  %1719 = vmatmul.mubr.msk.f32.vlgmr.msra.gmra.mxu1 %vm463_vm3, %v938_v13 }
 0xae9   : > { %1733 = vmatpush3.msra.mxu1 %v1985_v6  ;;  %1740 = vmatprep.mubr.msk.f32.mxu1 %vm1900_vm2, %v1899_v3 }
 0xaea   : > { %1734 = vmatprep.subr.mxu1 %v1899_v3 }
 0xaeb   : > { %1735 = vmatpush3.msra.mxu1 %v1987_v7 }
 0xaec   : > { %1736 = vmatprep.subr.mxu1 %v1899_v3 }
 0xaed   : > { %1737 = vmatpush3.msra.mxu1 %v1996_v11 }
 0xaee   : > { %1738 = vmatprep.subr.mxu1 %v1899_v3 }
 0xaef   : > { %1739 = vmatpush3.msra.mxu1 %v2000_v12 }
 0xba8   : > { %v1016_v18 = vpop.f32.mrf.mxu1 }
 0xba9   : > { %v1020_v19 = vadd.f32 %v1016_v18, %v441_v17  ;;  %v1290_v17 = vstv %s1289_s12 }
 0xbaa   : > { %v1720_v20 = vpop.f32.mrf.mxu1  ;;  %vm1291_vm1 = vcmp.lt.s32.totalorder %v1290_v17, %v2050_v29 }
 0xbab   : > { %1822 = vtanh.f32 %v1020_v19  ;;  %v1021_v22 = vmul.f32 0.5, %v1020_v19  ;;  %v1292_v15 = vsel %vm1291_vm1, 1, %v1902_v31 }
 0xbad   : > { %1824 = vtanh.f32 %v1021_v22 }
 0xbb8   : > { %v1823_v21 = vpop.eup %1822 }
 0xbb9   : > { %1032 = vrot.lane.b32.xlu1 %v1823_v21, %s1901_s19 }
 0xbba   : > { %v1825_v23 = vpop.eup %1824 }
 0xbbb   : > { %v1023_v24 = vadd.f32 1.0, %v1825_v23 }
 0xbbd   : > { %v1024_v26 = vmul.f32 0.5, %v1023_v24 }
 0xbbf   : > { %v1030_v32 = vmul.f32 %v1028_v30, %v1024_v26 }
 0xc2b   : > { %v1033_v27 = vpop.permute.xlu1 %1032 }
 0xc2c   : > { %v1035_v28 = vmul.f32 %v1033_v27, %v1024_v26 }
 0xc2e   : > { %1037 = vrot.lane.b32.xlu1 %v1035_v28, %s1901_s19 }
 0xc32   : > { %1052 = vperm.xlu1 %1793, %v1050_v49  }
 0xca0   : > { %v1038_v14 = vpop.permute.xlu1 %1037 }
 0xca1   : > { %v1040_v33 = vadd.f32 %v1038_v14, %v1030_v32 }
 0xca3   : > { %1826 = vtanh.f32 %v1040_v33  ;;  %1061 = vrot.lane.b32.xlu1 %v1040_v33, %s1904_s29  ;;  %v456_v33 = vcombine.high %v446_v2, %v446_v2 }
 0xcad   : > { %v1053_v35 = vpop.permute.xlu1 %1052 }
 0xcae   : > { %vm1054_vm14 = vcmp.eq.s32.totalorder %v1053_v35, 1 }
 0xcb0   : > { %v1827_v34 = vpop.eup %1826 }
 0xcb1   : > { %1043 = vrot.lane.b32.xlu0 %v1827_v34, %s1901_s19 }
 0xd15   : > { %v1062_v36 = vpop.permute.xlu1 %1061 }
 0xd16   : > { %v1064_v37 = vsel %vm1054_vm14, %v1062_v36, %v943_v5 }
 0xd17   : > { %1148 = vrot.lane.b32.xlu1 %v1064_v37, %s1901_s19 }
 0xd23   : > { %v1044_v38 = vpop.permute.xlu0 %1043 }
 0xd24   : > { %v1046_v39 = vmul.f32 %v1044_v38, %v1024_v26 }
 0xd26   : > { %1056 = vrot.lane.b32.xlu0 %v1046_v39, %s1903_s28 }
 0xd98   : > { %v1057_v40 = vpop.permute.xlu0 %1056 }
 0xd99   : > { %v1059_v41 = vsel %vm1054_vm14, %v1057_v40, %v938_v13  ;;  %v1065_v42 = vsel %vm1054_vm14, %v1057_v40, 0.0 }
 0xd9a   : > { %1585 = vst.msk [vmem:[%s1975_s10 + $0x10] sm:$0xf] %vm582_vm6, %v1065_v42  ;;  %1730 = vmatmul.mubr.msk.f32.vlgmr.msra.gmra.mxu0 %vm463_vm3, %v1059_v41 }
 0xd9b   : > { %1744 = vmatpush3.msra.mxu0 %v1985_v6  ;;  %1751 = vmatprep.mubr.msk.f32.mxu0 %vm1900_vm2, %v1899_v3 }
 0xd9c   : > { %1745 = vmatprep.subr.mxu0 %v1899_v3 }
 0xd9d   : > { %1746 = vmatpush3.msra.mxu0 %v1987_v7 }
 0xd9e   : > { %1747 = vmatprep.subr.mxu0 %v1899_v3 }
 0xd9f   : > { %1748 = vmatpush3.msra.mxu0 %v1996_v11 }
 0xda0   : > { %1749 = vmatprep.subr.mxu0 %v1899_v3  ;;  %v1171_v3 = vsel %vm1170_vm15, 1, %v1902_v31 }
 0xda1   : > { %1750 = vmatpush3.msra.mxu0 %v2000_v12  ;;  %v1149_v12 = vpop.permute.xlu1 %1148 }
 0xe5a   : > { %v1137_v44 = vpop.f32.mrf.mxu0 }
 0xe5b   : > { %v1141_v45 = vadd.f32 %v1137_v44, %v455_v43 }
 0xe5c   : > { %v1731_v6 = vpop.f32.mrf.mxu0 }
 0xe5d   : > { %1828 = vtanh.f32 %v1141_v45  ;;  %v1142_v47 = vmul.f32 0.5, %v1141_v45 }
 0xe5f   : > { %1830 = vtanh.f32 %v1142_v47 }
 0xe6a   : > { %v1829_v46 = vpop.eup %1828 }
 0xe6b   : > { %1153 = vrot.lane.b32.xlu0 %v1829_v46, %s1901_s19 }
 0xe6c   : > { %v1831_v7 = vpop.eup %1830 }
 0xe6d   : > { %v1144_v50 = vadd.f32 1.0, %v1831_v7 }
 0xe6f   : > { %v1145_v52 = vmul.f32 0.5, %v1144_v50 }
 0xe71   : > { %v1151_v54 = vmul.f32 %v1149_v12, %v1145_v52 }
 0xedd   : > { %v1154_v11 = vpop.permute.xlu0 %1153 }
 0xede   : > { %v1156_v53 = vmul.f32 %v1154_v11, %v1145_v52 }
 0xee0   : > { %1158 = vrot.lane.b32.xlu0 %v1156_v53, %s1901_s19 }
 0xee4   : > { %1173 = vperm.xlu0 %1792, %v1171_v3  }
 0xf52   : > { %v1159_v55 = vpop.permute.xlu0 %1158 }
 0xf53   : > { %v1161_v56 = vadd.f32 %v1159_v55, %v1151_v54 }
 0xf55   : > { %1832 = vtanh.f32 %v1161_v56  ;;  %1182 = vrot.lane.b32.xlu0 %v1161_v56, %s1904_s29 }
 0xf5f   : > { %v1174_v58 = vpop.permute.xlu0 %1173 }
 0xf60   : > { %vm1175_vm0 = vcmp.eq.s32.totalorder %v1174_v58, 1 }
 0xf62   : > { %v1833_v57 = vpop.eup %1832 }
 0xf63   : > { %1164 = vrot.lane.b32.xlu1 %v1833_v57, %s1901_s19 }
 0xfc7   : > { %v1183_v59 = vpop.permute.xlu0 %1182 }
 0xfc8   : > { %v1185_v60 = vsel %vm1175_vm0, %v1183_v59, %v1064_v37 }
 0xfc9   : > { %1269 = vrot.lane.b32.xlu0 %v1185_v60, %s1901_s19 }
 0xfd5   : > { %v1165_v61 = vpop.permute.xlu1 %1164 }
 0xfd6   : > { %v1167_v62 = vmul.f32 %v1165_v61, %v1145_v52 }
 0xfd8   : > { %1177 = vrot.lane.b32.xlu1 %v1167_v62, %s1903_s28 }
0x103b   : > { %v1270_v48 = vpop.permute.xlu0 %1269 }
0x104a   : > { %v1178_v63 = vpop.permute.xlu1 %1177 }
0x104b   : > { %v1180_v0 = vsel %vm1175_vm0, %v1178_v63, %v1059_v41  ;;  %v1186_v1 = vsel %vm1175_vm0, %v1178_v63, 0.0  ;;  %v1411_v41 = vstv %s1410_s13 }
0x104c   : > { %1587 = vst.msk [vmem:[%s1975_s10 + $0x14] sm:$0xf] %vm582_vm6, %v1186_v1  ;;  %1741 = vmatmul.mubr.msk.f32.vlgmr.msra.gmra.mxu1 %vm463_vm3, %v1180_v0  ;;  %vm1412_vm4 = vcmp.lt.s32.totalorder %v1411_v41, %v2050_v29 }
0x104d   : > { %v1413_v45 = vsel %vm1412_vm4, 1, %v1902_v31 }
0x110c   : > { %v1258_v4 = vpop.f32.mrf.mxu1 }
0x110d   : > { %v1262_v5 = vadd.f32 %v1258_v4, %v446_v2 }
0x110e   : > { %v1742_v8 = vpop.f32.mrf.mxu1 }
0x110f   : > { %1834 = vtanh.f32 %v1262_v5  ;;  %v1263_v10 = vmul.f32 0.5, %v1262_v5 }
0x1111   : > { %1836 = vtanh.f32 %v1263_v10 }
0x111c   : > { %v1835_v9 = vpop.eup %1834 }
0x111d   : > { %1274 = vrot.lane.b32.xlu1 %v1835_v9, %s1901_s19 }
0x111e   : > { %v1837_v13 = vpop.eup %1836 }
0x111f   : > { %v1265_v16 = vadd.f32 1.0, %v1837_v13 }
0x1121   : > { %v1266_v18 = vmul.f32 0.5, %v1265_v16 }
0x1123   : > { %v1272_v21 = vmul.f32 %v1270_v48, %v1266_v18 }
0x118f   : > { %v1275_v19 = vpop.permute.xlu1 %1274 }
0x1190   : > { %v1277_v20 = vmul.f32 %v1275_v19, %v1266_v18 }
0x1192   : > { %1279 = vrot.lane.b32.xlu1 %v1277_v20, %s1901_s19 }
0x1196   : > { %1294 = vperm.xlu1 %1793, %v1292_v15  }
0x1204   : > { %v1280_v22 = vpop.permute.xlu1 %1279 }
0x1205   : > { %v1282_v23 = vadd.f32 %v1280_v22, %v1272_v21 }
0x1207   : > { %1838 = vtanh.f32 %v1282_v23  ;;  %1303 = vrot.lane.b32.xlu1 %v1282_v23, %s1904_s29 }
0x1211   : > { %v1295_v25 = vpop.permute.xlu1 %1294 }
0x1212   : > { %vm1296_vm2 = vcmp.eq.s32.totalorder %v1295_v25, 1 }
0x1214   : > { %v1839_v24 = vpop.eup %1838 }
0x1215   : > { %1285 = vrot.lane.b32.xlu0 %v1839_v24, %s1901_s19 }
0x1279   : > { %v1304_v26 = vpop.permute.xlu1 %1303 }
0x127a   : > { %v1306_v27 = vsel %vm1296_vm2, %v1304_v26, %v1185_v60 }
0x127b   : > { %1390 = vrot.lane.b32.xlu1 %v1306_v27, %s1901_s19 }
0x1287   : > { %v1286_v28 = vpop.permute.xlu0 %1285 }
0x1288   : > { %v1288_v49 = vmul.f32 %v1286_v28, %v1266_v18 }
0x128a   : > { %1298 = vrot.lane.b32.xlu0 %v1288_v49, %s1903_s28 }
0x12ed   : > { %v1391_v6 = vpop.permute.xlu1 %1390 }
0x12fc   : > { %v1299_v30 = vpop.permute.xlu0 %1298 }
0x12fd   : > { %v1301_v32 = vsel %vm1296_vm2, %v1299_v30, %v1180_v0  ;;  %v1307_v14 = vsel %vm1296_vm2, %v1299_v30, 0.0 }
0x12fe   : > { %1589 = vst.msk [vmem:[%s1975_s10 + $0x18] sm:$0xf] %vm582_vm6, %v1307_v14  ;;  %1752 = vmatmul.mubr.msk.f32.vlgmr.msra.gmra.mxu0 %vm463_vm3, %v1301_v32 }
0x13be   : > { %v1379_v34 = vpop.f32.mrf.mxu0 }
0x13bf   : > { %v1383_v35 = vadd.f32 %v1379_v34, %v456_v33 }
0x13c0   : > { %v1753_v36 = vpop.f32.mrf.mxu0 }
0x13c1   : > { %1840 = vtanh.f32 %v1383_v35  ;;  %v1384_v38 = vmul.f32 0.5, %v1383_v35 }
0x13c3   : > { %1842 = vtanh.f32 %v1384_v38 }
0x13ce   : > { %v1841_v37 = vpop.eup %1840 }
0x13cf   : > { %1395 = vrot.lane.b32.xlu0 %v1841_v37, %s1901_s19 }
0x13d0   : > { %v1843_v39 = vpop.eup %1842 }
0x13d1   : > { %v1386_v40 = vadd.f32 1.0, %v1843_v39 }
0x13d3   : > { %v1387_v42 = vmul.f32 0.5, %v1386_v40 }
0x13d5   : > { %v1393_v46 = vmul.f32 %v1391_v6, %v1387_v42 }
0x1441   : > { %v1396_v43 = vpop.permute.xlu0 %1395 }
0x1442   : > { %v1398_v44 = vmul.f32 %v1396_v43, %v1387_v42 }
0x1444   : > { %1400 = vrot.lane.b32.xlu0 %v1398_v44, %s1901_s19 }
0x1448   : > { %1415 = vperm.xlu0 %1792, %v1413_v45  }
0x14b6   : > { %v1401_v47 = vpop.permute.xlu0 %1400 }
0x14b7   : > { %v1403_v7 = vadd.f32 %v1401_v47, %v1393_v46 }
0x14b9   : > { %1844 = vtanh.f32 %v1403_v7  ;;  %1424 = vrot.lane.b32.xlu0 %v1403_v7, %s1904_s29 }
0x14c3   : > { %v1416_v51 = vpop.permute.xlu0 %1415 }
0x14c4   : > { %vm1417_vm3 = vcmp.eq.s32.totalorder %v1416_v51, 1 }
0x14c6   : > { %v1845_v50 = vpop.eup %1844 }
0x14c7   : > { %1406 = vrot.lane.b32.xlu1 %v1845_v50, %s1901_s19 }
0x152b   : > { %v1425_v52 = vpop.permute.xlu0 %1424 }
0x152c   : > { %v1427_v29 = vsel %vm1417_vm3, %v1425_v52, %v1306_v27 }
0x152d   : > { %1432 = vst.msk [vmem:[#allocation3] sm:$0xf] %vm582_vm6, %v1427_v29 }
0x1539   : > { %v1407_v11 = vpop.permute.xlu1 %1406 }
0x153a   : > { %v1409_v31 = vmul.f32 %v1407_v11, %v1387_v42 }
0x153c   : > { %1419 = vrot.lane.b32.xlu1 %v1409_v31, %s1903_s28 }
0x15ac   : > { %1436 = sbr.rel (%p1592_p6) target bundleno = 5561 (0x15b9), region = 48 }
0x15ae   : > { %v1420_v53 = vpop.permute.xlu1 %1419 }
0x15af   : > { %v1422_v3 = vsel %vm1417_vm3, %v1420_v53, %v1301_v32  ;;  %v1428_v12 = vsel %vm1417_vm3, %v1420_v53, 0.0 }
0x15b0   : > { %1591 = vst.msk [vmem:[%s1975_s10 + $0x1c] sm:$0xf] %vm582_vm6, %v1428_v12  ;;  %1431 = vst.msk [vmem:[#allocation2] sm:$0xf] %vm582_vm6, %v1422_v3 }
0x15b7   : > { %v1437_v54 = vld [vmem:[#allocation2] sm:$0xf] }
0x15b8   : > { %1438 = vst.msk [vmem:[#allocation4] sm:$0xf] %vm582_vm6, %v1437_v54 }
0x15b9 PF: > { %p2219_p7 = scmp.eq.s32.totalorder %s1560_s24, 1  ;;  %s1905_s14 = smov [#allocation4]  }
0x15ba   : > { %s1460_s15 = sshll.u32 %s1905_s14, 4  ;;  %s1461_s15 = int_to_ptr.vmem [resolvable:$true] %s1460_s15 }
0x15bb   : > { %s1846_s10 = scalar_lea.vmem %s1461_s15, 64  ;;  %p1853_p11 = scmp.lt.s32.totalorder %s1461_s15, %s1461_s15 }
0x15bc   : > { %p1847_p8 = scmp.ne.s32.totalorder %s1461_s15, %s1846_s10  ;;  %p1854_p12 = scmp.lt.s32.totalorder %s1846_s10, %s1846_s10 }
0x15be   : > { %p1848_p9 = pnand %p1847_p8, %p2219_p7  ;;  %p1855_p13 = por %p1854_p12, %p1853_p11 }
0x15c0   : > { %p1849_p10 = pneg %p1848_p9 }
0x15c2   : > { %p1856_p0 = pnand %p1855_p13, %p1849_p10 }
0x15c4   : > { %1859 = shalt.err (!%p1856_p0)
}
0x15c5   : > { %1755 = dma.vmem_to_hbm [thread:$0]  (%p2219_p7), %s1461_s15, 64, %s2249_s6, [#allocation5]  }
0x15c6   : > { %1883 = dma.done.wait (%p2219_p7), [#allocation5], 64  }
0x15c7   : > { %1885 = vsyncadd (%p2219_p7), [#allocation5], 4294967232 }
0x15c8 PF: > { %s18_s23 = sadd.s32 1, %s1896_s23   ;;  %s2251_s21 = smov %s1892_s22 }
0x15c9   : > { %p15_p1 = scmp.ge.s32.totalorder %s18_s23, 4   ;;  %s2252_s22 = smov %s2254_s25 }
0x15cb   :  { %17 = sbr.rel (!%p15_p1) target bundleno = 2 (0x2), region = 98 }
0x15d0   :  { %1484 = vsyncpa [#allocation5], 1 }
0x15d1   :  { %1486 = vsyncpa [#allocation5 + $0x1], 1 }

</bundles_post_ra>
